<compile_context>
chip_gen: v7x
topology: tpu7x:2x2x1
jax: 0.10.0
libtpu: 0.0.40
codegen_flags: <defaults>
</compile_context>

<pallas_src>
import functools
import math

import jax
import jax.numpy as jnp
from jax import lax
from jax.experimental import pallas as pl
from jax.experimental.pallas import tpu as pltpu


# ----------------------------------------------------------------------------
# Fused per-layer Pallas kernel
# ----------------------------------------------------------------------------
def _fused_layer_kernel(
    pad_ref, x_ref, pos_ref, ln0g_ref, ln0b_ref,
    wqkv_ref, bqkv_ref, wo_ref, bo_ref, ln1g_ref, ln1b_ref,
    w1_ref, b1_ref, w2_ref, b2_ref, ln2g_ref, ln2b_ref,
    ffn_ref, attn_ref, ctx_ref,
    *, n_heads, eps, scale, apply_input_ln):
    L, D = x_ref.shape[1], x_ref.shape[2]
    dh = D // n_heads

    def ln(y, g_ref, b_ref):
        mu = jnp.mean(y, axis=-1, keepdims=True)
        var = jnp.mean(jnp.square(y - mu), axis=-1, keepdims=True)
        yn = (y - mu) * lax.rsqrt(var + eps)
        return yn * g_ref[...].astype(jnp.float32) + b_ref[...].astype(jnp.float32)

    def mm(a, w_ref, b_ref):
        # bf16 MXU operands, f32 accumulation
        return jnp.dot(a.astype(jnp.bfloat16), w_ref[...].astype(jnp.bfloat16),
                       preferred_element_type=jnp.float32) + b_ref[...].astype(jnp.float32)

    x = x_ref[0].astype(jnp.float32)                       # (L, D) hidden for this batch row
    if apply_input_ln:                                     # embedding LayerNorm fused into layer 0
        x = ln(x, ln0g_ref, ln0b_ref)

    a_in = x + pos_ref[...].astype(jnp.float32)            # per-layer positional injection

    qkv = mm(a_in, wqkv_ref, bqkv_ref)                     # (L, 3D) fused Q|K|V projection

    # Additive attention bias built in-register: (1 - causal * key_pad) * -10000
    pad = pad_ref[0].astype(jnp.float32)                   # (1, L): 1.0 where item_seq > 0
    rows = lax.broadcasted_iota(jnp.int32, (L, L), 0)
    cols = lax.broadcasted_iota(jnp.int32, (L, L), 1)
    causal = (cols <= rows).astype(jnp.float32)            # lower-triangular
    bias = (1.0 - causal * pad) * -10000.0                 # (L, L)

    # Per-head attention; context assembled into a lane-dense (L, D) VMEM scratch.
    for h in range(n_heads):                               # static unroll (n_heads is small)
        qh = qkv[:, h * dh:(h + 1) * dh]
        kh = qkv[:, D + h * dh:D + (h + 1) * dh]
        vh = qkv[:, 2 * D + h * dh:2 * D + (h + 1) * dh]
        s = jnp.dot(qh.astype(jnp.bfloat16), kh.astype(jnp.bfloat16).T,
                    preferred_element_type=jnp.float32)
        s = s * scale + bias
        s = s - jnp.max(s, axis=-1, keepdims=True)
        p = jnp.exp(s)
        p = p * pl.reciprocal(jnp.sum(p, axis=-1, keepdims=True), approx=True)
        ctx_ref[:, h * dh:(h + 1) * dh] = jnp.dot(
            p.astype(jnp.bfloat16), vh.astype(jnp.bfloat16),
            preferred_element_type=jnp.float32)

    a_proj = mm(ctx_ref[...], wo_ref, bo_ref)              # (L, D)
    attn_out = ln(a_proj + x, ln1g_ref, ln1b_ref)          # post-LN, residual vs hidden

    h1 = mm(attn_out, w1_ref, b1_ref)                      # (L, inner)
    # TODO(synk): tanh-approximate GELU; PyTorch nn.GELU default is erf-based (tiny delta).
    h1 = 0.5 * h1 * (1.0 + jnp.tanh(0.7978845608028654 * (h1 + 0.044715 * h1 * h1 * h1)))
    f_proj = mm(h1, w2_ref, b2_ref)                        # (L, D)
    ffn_out = ln(f_proj + attn_out, ln2g_ref, ln2b_ref)

    attn_ref[0] = attn_out.astype(attn_ref.dtype)
    ffn_ref[0] = ffn_out.astype(ffn_ref.dtype)


def fused_layer(hidden, pad, pos_emb, ln0_g, ln0_b, lp, *, n_heads, eps, apply_input_ln):
    """hidden: (B, L, D); pad: (B, 1, L); pos_emb: (L, D). Returns (ffn_out, attn_out)."""
    B, L, D = hidden.shape
    inner = lp["w1"].shape[1]
    scale = 1.0 / math.sqrt(D // n_heads)

    def fixed(shape):
        n = len(shape)
        return pl.BlockSpec(shape, lambda b: (0,) * n)     # weight resident across grid

    batched3 = pl.BlockSpec((1, L, D), lambda b: (b, 0, 0))
    in_specs = [
        pl.BlockSpec((1, 1, L), lambda b: (b, 0, 0)),      # pad mask
        batched3,                                          # hidden
        fixed((L, D)),                                     # pos_emb
        fixed((1, D)), fixed((1, D)),                      # embedding-LN gamma / beta
        fixed((D, 3 * D)), fixed((1, 3 * D)),              # fused wqkv / bqkv
        fixed((D, D)), fixed((1, D)),                      # wo / bo
        fixed((1, D)), fixed((1, D)),                      # ln1 gamma / beta
        fixed((D, inner)), fixed((1, inner)),              # w1 / b1
        fixed((inner, D)), fixed((1, D)),                  # w2 / b2
        fixed((1, D)), fixed((1, D)),                      # ln2 gamma / beta
    ]
    kernel = functools.partial(
        _fused_layer_kernel, n_heads=n_heads, eps=eps, scale=scale,
        apply_input_ln=apply_input_ln)
    ffn_out, attn_out = pl.pallas_call(
        kernel,
        grid=(B,),
        in_specs=in_specs,
        out_specs=(batched3, batched3),
        out_shape=(jax.ShapeDtypeStruct((B, L, D), hidden.dtype),
                   jax.ShapeDtypeStruct((B, L, D), hidden.dtype)),
        scratch_shapes=[pltpu.VMEM((L, D), jnp.float32)],  # lane-dense per-row context
        compiler_params=pltpu.CompilerParams(
            dimension_semantics=("parallel",),
            vmem_limit_bytes=32 * 1024 * 1024),
    )(pad, hidden, pos_emb, ln0_g, ln0_b,
      lp["wqkv"], lp["bqkv"], lp["wo"], lp["bo"], lp["ln1_g"], lp["ln1_b"],
      lp["w1"], lp["b1"], lp["w2"], lp["b2"], lp["ln2_g"], lp["ln2_b"])
    return ffn_out, attn_out


# ----------------------------------------------------------------------------
# Parameter init (deterministic, matching __init__ shapes; std = initializer_range)
# ----------------------------------------------------------------------------
def init_model_params(key, n_items, max_seq_len, D, inner, n_layers, std=0.02):
    def normal(k, shape):
        return std * jax.random.normal(k, shape, jnp.float32)

    keys = jax.random.split(key, 2 + n_layers)
    item_emb = normal(keys[0], (n_items, D)).at[0].set(0.0)   # padding_idx = 0
    pos_emb = normal(keys[1], (max_seq_len, D))
    params = dict(
        item_emb=item_emb,
        pos_emb=pos_emb,
        ln_g=jnp.ones((1, D), jnp.float32),
        ln_b=jnp.zeros((1, D), jnp.float32),
        layers=[],
    )
    for l in range(n_layers):
        ks = jax.random.split(keys[2 + l], 6)
        wq = normal(ks[0], (D, D)); wk = normal(ks[1], (D, D)); wv = normal(ks[2], (D, D))
        params["layers"].append(dict(
            wqkv=jnp.concatenate([wq, wk, wv], axis=1),        # fused (D, 3D)
            bqkv=jnp.zeros((1, 3 * D), jnp.float32),
            wo=normal(ks[3], (D, D)), bo=jnp.zeros((1, D), jnp.float32),
            ln1_g=jnp.ones((1, D), jnp.float32), ln1_b=jnp.zeros((1, D), jnp.float32),
            w1=normal(ks[4], (D, inner)), b1=jnp.zeros((1, inner), jnp.float32),
            w2=normal(ks[5], (inner, D)), b2=jnp.zeros((1, D), jnp.float32),
            ln2_g=jnp.ones((1, D), jnp.float32), ln2_b=jnp.zeros((1, D), jnp.float32),
        ))
    return params


# ----------------------------------------------------------------------------
# Model forward (embedding gather / final index gather in plain JAX; one fused
# Pallas kernel per transformer layer)
# ----------------------------------------------------------------------------
def gather_indexes(output, gather_index):
    """output: (B, L, D); gather_index: (B,) -> (B, D)."""
    B, _, D = output.shape
    idx = jnp.broadcast_to(gather_index[:, None, None], (B, 1, D))
    return jnp.take_along_axis(output, idx, axis=1)[:, 0, :]


def forward(params, item_seq, item_seq_len, n_heads, eps):
    B, L = item_seq.shape
    D = params["item_emb"].shape[1]

    hidden = params["item_emb"][item_seq]                     # (B, L, D) embedding gather
    pos_emb = params["pos_emb"][:L]                           # (L, D)
    pad = (item_seq > 0).astype(jnp.float32).reshape(B, 1, L)  # key-padding mask
    # dropout: identity (eval mode)

    ffn_out, attn_out = hidden, hidden
    for i, lp in enumerate(params["layers"]):
        ffn_out, attn_out = fused_layer(
            hidden, pad, pos_emb, params["ln_g"], params["ln_b"], lp,
            n_heads=n_heads, eps=eps, apply_input_ln=(i == 0))
        hidden = ffn_out

    # last layer's pair: output_list = [ffn_out, attn_out]
    all_hidden_out = attn_out.reshape(B, L * D)
    output = gather_indexes(ffn_out, item_seq_len - 1)
    return output, all_hidden_out


# ----------------------------------------------------------------------------
# Demo
# ----------------------------------------------------------------------------
if __name__ == "__main__":
    # params dict equivalents: max_seq_len=8, n_layers=2, n_heads=2, hidden_size=32,
    # inner_size=64, layer_norm_eps=1e-12, initializer_range=0.02; n_item=50
    B, L, D, H, INNER, N_LAYERS = 2, 8, 32, 2, 64, 2
    N_ITEMS = 50
    EPS = 1e-12

    key = jax.random.PRNGKey(0)
    k_param, k_seq = jax.random.split(key)

    params = init_model_params(k_param, N_ITEMS, L, D, INNER, N_LAYERS, std=0.02)

    item_seq = jax.random.randint(k_seq, (B, L), 1, N_ITEMS, dtype=jnp.int32)
    item_seq_len = jnp.array([L, 5], dtype=jnp.int32)
    # zero-pad positions beyond the sequence length (padding_idx = 0)
    item_seq = jnp.where(jnp.arange(L)[None, :] < item_seq_len[:, None], item_seq, 0)

    fwd = jax.jit(functools.partial(forward, n_heads=H, eps=EPS))
    output, all_hidden_out = fwd(params, item_seq, item_seq_len)
    jax.block_until_ready((output, all_hidden_out))

    assert output.shape == (B, D)
    assert all_hidden_out.shape == (B, L * D)
    assert bool(jnp.all(jnp.isfinite(output))) and bool(jnp.all(jnp.isfinite(all_hidden_out)))
    print("KERNEL_OK")
</pallas_src>

<mosaic_0001>
module attributes {stable_mosaic.version = 11 : i64} {
  func.func @_fused_layer_kernel(%arg0: i32, %arg1: memref<1x1x8xf32, #tpu.memory_space<vmem>>, %arg2: memref<1x8x32xf32, #tpu.memory_space<vmem>>, %arg3: memref<8x32xf32, #tpu.memory_space<vmem>>, %arg4: memref<1x32xf32, #tpu.memory_space<vmem>>, %arg5: memref<1x32xf32, #tpu.memory_space<vmem>>, %arg6: memref<32x96xf32, #tpu.memory_space<vmem>>, %arg7: memref<1x96xf32, #tpu.memory_space<vmem>>, %arg8: memref<32x32xf32, #tpu.memory_space<vmem>>, %arg9: memref<1x32xf32, #tpu.memory_space<vmem>>, %arg10: memref<1x32xf32, #tpu.memory_space<vmem>>, %arg11: memref<1x32xf32, #tpu.memory_space<vmem>>, %arg12: memref<32x64xf32, #tpu.memory_space<vmem>>, %arg13: memref<1x64xf32, #tpu.memory_space<vmem>>, %arg14: memref<64x32xf32, #tpu.memory_space<vmem>>, %arg15: memref<1x32xf32, #tpu.memory_space<vmem>>, %arg16: memref<1x32xf32, #tpu.memory_space<vmem>>, %arg17: memref<1x32xf32, #tpu.memory_space<vmem>>, %arg18: memref<1x8x32xf32, #tpu.memory_space<vmem>>, %arg19: memref<1x8x32xf32, #tpu.memory_space<vmem>>, %arg20: memref<8x32xf32, #tpu.memory_space<vmem>>) attributes {dimension_semantics = [#tpu.dimension_semantics<parallel>], iteration_bounds = array<i64: 2>, scalar_prefetch = 0 : i64, scratch_operands = 1 : i64, tpu.core_type = #tpu.core_type<tc>, window_params = [{transform_indices = @transform_0, window_bounds = array<i64: 1, 1, 8>}, {transform_indices = @transform_1, window_bounds = array<i64: 1, 8, 32>}, {pipeline_mode = #tpu.pipeline_mode<synchronous>, transform_indices = @transform_2, window_bounds = array<i64: 8, 32>}, {pipeline_mode = #tpu.pipeline_mode<synchronous>, transform_indices = @transform_3, window_bounds = array<i64: 1, 32>}, {pipeline_mode = #tpu.pipeline_mode<synchronous>, transform_indices = @transform_4, window_bounds = array<i64: 1, 32>}, {pipeline_mode = #tpu.pipeline_mode<synchronous>, transform_indices = @transform_5, window_bounds = array<i64: 32, 96>}, {pipeline_mode = #tpu.pipeline_mode<synchronous>, transform_indices = @transform_6, window_bounds = array<i64: 1, 96>}, {pipeline_mode = #tpu.pipeline_mode<synchronous>, transform_indices = @transform_7, window_bounds = array<i64: 32, 32>}, {pipeline_mode = #tpu.pipeline_mode<synchronous>, transform_indices = @transform_8, window_bounds = array<i64: 1, 32>}, {pipeline_mode = #tpu.pipeline_mode<synchronous>, transform_indices = @transform_9, window_bounds = array<i64: 1, 32>}, {pipeline_mode = #tpu.pipeline_mode<synchronous>, transform_indices = @transform_10, window_bounds = array<i64: 1, 32>}, {pipeline_mode = #tpu.pipeline_mode<synchronous>, transform_indices = @transform_11, window_bounds = array<i64: 32, 64>}, {pipeline_mode = #tpu.pipeline_mode<synchronous>, transform_indices = @transform_12, window_bounds = array<i64: 1, 64>}, {pipeline_mode = #tpu.pipeline_mode<synchronous>, transform_indices = @transform_13, window_bounds = array<i64: 64, 32>}, {pipeline_mode = #tpu.pipeline_mode<synchronous>, transform_indices = @transform_14, window_bounds = array<i64: 1, 32>}, {pipeline_mode = #tpu.pipeline_mode<synchronous>, transform_indices = @transform_15, window_bounds = array<i64: 1, 32>}, {pipeline_mode = #tpu.pipeline_mode<synchronous>, transform_indices = @transform_16, window_bounds = array<i64: 1, 32>}, {transform_indices = @transform_17, window_bounds = array<i64: 1, 8, 32>}, {transform_indices = @transform_18, window_bounds = array<i64: 1, 8, 32>}]} {
    %c0 = arith.constant 0 : index
    %c0_0 = arith.constant 0 : index
    %c0_1 = arith.constant 0 : index
    %0 = vector.load %arg2[%c0, %c0_0, %c0_1] : memref<1x8x32xf32, #tpu.memory_space<vmem>>, vector<1x8x32xf32>
    %1 = vector.shape_cast %0 : vector<1x8x32xf32> to vector<8x32xf32>
    %c0_2 = arith.constant 0 : index
    %c0_3 = arith.constant 0 : index
    %2 = vector.load %arg3[%c0_2, %c0_3] : memref<8x32xf32, #tpu.memory_space<vmem>>, vector<8x32xf32>
    %3 = arith.addf %1, %2 : vector<8x32xf32>
    %4 = arith.truncf %3 : vector<8x32xf32> to vector<8x32xbf16>
    %c0_4 = arith.constant 0 : index
    %c0_5 = arith.constant 0 : index
    %5 = vector.load %arg6[%c0_4, %c0_5] : memref<32x96xf32, #tpu.memory_space<vmem>>, vector<32x96xf32>
    %6 = arith.truncf %5 : vector<32x96xf32> to vector<32x96xbf16>
    %cst = arith.constant dense<0.000000e+00> : vector<8x96xf32>
    %7 = tpu.matmul %4, %6, %cst {dimension_numbers = #tpu.dot_dimension_numbers<[1], [0], [0], [1], [0, 0, 1, 1], [], []>} : vector<8x32xbf16>, vector<32x96xbf16>, vector<8x96xf32> -> vector<8x96xf32>
    %c0_6 = arith.constant 0 : index
    %c0_7 = arith.constant 0 : index
    %8 = vector.load %arg7[%c0_6, %c0_7] : memref<1x96xf32, #tpu.memory_space<vmem>>, vector<1x96xf32>
    %9 = vector.broadcast %8 : vector<1x96xf32> to vector<8x96xf32>
    %10 = arith.addf %7, %9 : vector<8x96xf32>
    %c0_8 = arith.constant 0 : index
    %c0_9 = arith.constant 0 : index
    %c0_10 = arith.constant 0 : index
    %11 = vector.load %arg1[%c0_8, %c0_9, %c0_10] : memref<1x1x8xf32, #tpu.memory_space<vmem>>, vector<1x1x8xf32>
    %12 = vector.shape_cast %11 : vector<1x1x8xf32> to vector<1x8xf32>
    %13 = tpu.iota {dimensions = array<i32: 0>} : vector<8x8xi32>
    %14 = tpu.iota {dimensions = array<i32: 1>} : vector<8x8xi32>
    %15 = arith.cmpi sle, %14, %13 : vector<8x8xi32>
    %16 = arith.extui %15 : vector<8x8xi1> to vector<8x8xi32>
    %17 = arith.sitofp %16 : vector<8x8xi32> to vector<8x8xf32>
    %18 = vector.broadcast %12 : vector<1x8xf32> to vector<8x8xf32>
    %19 = arith.mulf %17, %18 : vector<8x8xf32>
    %cst_11 = arith.constant 1.000000e+00 : f32
    %20 = vector.broadcast %cst_11 : f32 to vector<8x8xf32>
    %21 = arith.subf %20, %19 : vector<8x8xf32>
    %cst_12 = arith.constant -1.000000e+04 : f32
    %22 = vector.broadcast %cst_12 : f32 to vector<8x8xf32>
    %23 = arith.mulf %21, %22 : vector<8x8xf32>
    %24 = vector.extract_strided_slice %10 {offsets = [0, 0], sizes = [8, 16], strides = [1, 1]} : vector<8x96xf32> to vector<8x16xf32>
    %25 = vector.extract_strided_slice %10 {offsets = [0, 32], sizes = [8, 16], strides = [1, 1]} : vector<8x96xf32> to vector<8x16xf32>
    %26 = vector.extract_strided_slice %10 {offsets = [0, 64], sizes = [8, 16], strides = [1, 1]} : vector<8x96xf32> to vector<8x16xf32>
    %27 = arith.truncf %24 : vector<8x16xf32> to vector<8x16xbf16>
    %28 = arith.truncf %25 : vector<8x16xf32> to vector<8x16xbf16>
    %29 = tpu.transpose %28, [1, 0] : vector<8x16xbf16> -> vector<16x8xbf16>
    %cst_13 = arith.constant dense<0.000000e+00> : vector<8x8xf32>
    %30 = tpu.matmul %27, %29, %cst_13 {dimension_numbers = #tpu.dot_dimension_numbers<[1], [0], [0], [1], [0, 0, 1, 1], [], []>} : vector<8x16xbf16>, vector<16x8xbf16>, vector<8x8xf32> -> vector<8x8xf32>
    %cst_14 = arith.constant 2.500000e-01 : f32
    %31 = vector.broadcast %cst_14 : f32 to vector<8x8xf32>
    %32 = arith.mulf %30, %31 : vector<8x8xf32>
    %33 = arith.addf %32, %23 : vector<8x8xf32>
    %cst_15 = arith.constant dense<0xFF800000> : vector<8xf32>
    %34 = vector.multi_reduction <maximumf>, %33, %cst_15 [1] : vector<8x8xf32> to vector<8xf32>
    %35 = vector.shape_cast %34 : vector<8xf32> to vector<8x1xf32>
    %36 = vector.broadcast %35 : vector<8x1xf32> to vector<8x8xf32>
    %37 = arith.subf %33, %36 : vector<8x8xf32>
    %38 = math.exp %37 : vector<8x8xf32>
    %cst_16 = arith.constant dense<0.000000e+00> : vector<8xf32>
    %39 = vector.multi_reduction <add>, %38, %cst_16 [1] : vector<8x8xf32> to vector<8xf32>
    %40 = vector.shape_cast %39 : vector<8xf32> to vector<8x1xf32>
    %41 = tpu.reciprocal %40 {approx = true} : vector<8x1xf32> -> vector<8x1xf32>
    %42 = vector.broadcast %41 : vector<8x1xf32> to vector<8x8xf32>
    %43 = arith.mulf %38, %42 : vector<8x8xf32>
    %44 = arith.truncf %43 : vector<8x8xf32> to vector<8x8xbf16>
    %45 = arith.truncf %26 : vector<8x16xf32> to vector<8x16xbf16>
    %cst_17 = arith.constant dense<0.000000e+00> : vector<8x16xf32>
    %46 = tpu.matmul %44, %45, %cst_17 {dimension_numbers = #tpu.dot_dimension_numbers<[1], [0], [0], [1], [0, 0, 1, 1], [], []>} : vector<8x8xbf16>, vector<8x16xbf16>, vector<8x16xf32> -> vector<8x16xf32>
    %c0_18 = arith.constant 0 : index
    %c0_19 = arith.constant 0 : index
    %47 = vector.load %arg20[%c0_18, %c0_19] : memref<8x32xf32, #tpu.memory_space<vmem>>, vector<8x16xf32>
    tpu.vector_store %arg20[%c0_18, %c0_19], %46 {strides = array<i32>} : memref<8x32xf32, #tpu.memory_space<vmem>>, vector<8x16xf32>,
    %48 = vector.extract_strided_slice %10 {offsets = [0, 16], sizes = [8, 16], strides = [1, 1]} : vector<8x96xf32> to vector<8x16xf32>
    %49 = vector.extract_strided_slice %10 {offsets = [0, 48], sizes = [8, 16], strides = [1, 1]} : vector<8x96xf32> to vector<8x16xf32>
    %50 = vector.extract_strided_slice %10 {offsets = [0, 80], sizes = [8, 16], strides = [1, 1]} : vector<8x96xf32> to vector<8x16xf32>
    %51 = arith.truncf %48 : vector<8x16xf32> to vector<8x16xbf16>
    %52 = arith.truncf %49 : vector<8x16xf32> to vector<8x16xbf16>
    %53 = tpu.transpose %52, [1, 0] : vector<8x16xbf16> -> vector<16x8xbf16>
    %cst_20 = arith.constant dense<0.000000e+00> : vector<8x8xf32>
    %54 = tpu.matmul %51, %53, %cst_20 {dimension_numbers = #tpu.dot_dimension_numbers<[1], [0], [0], [1], [0, 0, 1, 1], [], []>} : vector<8x16xbf16>, vector<16x8xbf16>, vector<8x8xf32> -> vector<8x8xf32>
    %cst_21 = arith.constant 2.500000e-01 : f32
    %55 = vector.broadcast %cst_21 : f32 to vector<8x8xf32>
    %56 = arith.mulf %54, %55 : vector<8x8xf32>
    %57 = arith.addf %56, %23 : vector<8x8xf32>
    %cst_22 = arith.constant dense<0xFF800000> : vector<8xf32>
    %58 = vector.multi_reduction <maximumf>, %57, %cst_22 [1] : vector<8x8xf32> to vector<8xf32>
    %59 = vector.shape_cast %58 : vector<8xf32> to vector<8x1xf32>
    %60 = vector.broadcast %59 : vector<8x1xf32> to vector<8x8xf32>
    %61 = arith.subf %57, %60 : vector<8x8xf32>
    %62 = math.exp %61 : vector<8x8xf32>
    %cst_23 = arith.constant dense<0.000000e+00> : vector<8xf32>
    %63 = vector.multi_reduction <add>, %62, %cst_23 [1] : vector<8x8xf32> to vector<8xf32>
    %64 = vector.shape_cast %63 : vector<8xf32> to vector<8x1xf32>
    %65 = tpu.reciprocal %64 {approx = true} : vector<8x1xf32> -> vector<8x1xf32>
    %66 = vector.broadcast %65 : vector<8x1xf32> to vector<8x8xf32>
    %67 = arith.mulf %62, %66 : vector<8x8xf32>
    %68 = arith.truncf %67 : vector<8x8xf32> to vector<8x8xbf16>
    %69 = arith.truncf %50 : vector<8x16xf32> to vector<8x16xbf16>
    %cst_24 = arith.constant dense<0.000000e+00> : vector<8x16xf32>
    %70 = tpu.matmul %68, %69, %cst_24 {dimension_numbers = #tpu.dot_dimension_numbers<[1], [0], [0], [1], [0, 0, 1, 1], [], []>} : vector<8x8xbf16>, vector<8x16xbf16>, vector<8x16xf32> -> vector<8x16xf32>
    %c0_25 = arith.constant 0 : index
    %c16 = arith.constant 16 : index
    %71 = vector.load %arg20[%c0_25, %c16] : memref<8x32xf32, #tpu.memory_space<vmem>>, vector<8x16xf32>
    tpu.vector_store %arg20[%c0_25, %c16], %70 {strides = array<i32>} : memref<8x32xf32, #tpu.memory_space<vmem>>, vector<8x16xf32>,
    %c0_26 = arith.constant 0 : index
    %c0_27 = arith.constant 0 : index
    %72 = vector.load %arg20[%c0_26, %c0_27] : memref<8x32xf32, #tpu.memory_space<vmem>>, vector<8x32xf32>
    %73 = arith.truncf %72 : vector<8x32xf32> to vector<8x32xbf16>
    %c0_28 = arith.constant 0 : index
    %c0_29 = arith.constant 0 : index
    %74 = vector.load %arg8[%c0_28, %c0_29] : memref<32x32xf32, #tpu.memory_space<vmem>>, vector<32x32xf32>
    %75 = arith.truncf %74 : vector<32x32xf32> to vector<32x32xbf16>
    %cst_30 = arith.constant dense<0.000000e+00> : vector<8x32xf32>
    %76 = tpu.matmul %73, %75, %cst_30 {dimension_numbers = #tpu.dot_dimension_numbers<[1], [0], [0], [1], [0, 0, 1, 1], [], []>} : vector<8x32xbf16>, vector<32x32xbf16>, vector<8x32xf32> -> vector<8x32xf32>
    %c0_31 = arith.constant 0 : index
    %c0_32 = arith.constant 0 : index
    %77 = vector.load %arg9[%c0_31, %c0_32] : memref<1x32xf32, #tpu.memory_space<vmem>>, vector<1x32xf32>
    %78 = vector.broadcast %77 : vector<1x32xf32> to vector<8x32xf32>
    %79 = arith.addf %76, %78 : vector<8x32xf32>
    %80 = arith.addf %79, %1 : vector<8x32xf32>
    %cst_33 = arith.constant dense<0.000000e+00> : vector<8xf32>
    %81 = vector.multi_reduction <add>, %80, %cst_33 [1] : vector<8x32xf32> to vector<8xf32>
    %82 = vector.shape_cast %81 : vector<8xf32> to vector<8x1xf32>
    %cst_34 = arith.constant 3.200000e+01 : f32
    %83 = vector.broadcast %cst_34 : f32 to vector<8x1xf32>
    %84 = arith.divf %82, %83 : vector<8x1xf32>
    %85 = vector.broadcast %84 : vector<8x1xf32> to vector<8x32xf32>
    %86 = arith.subf %80, %85 : vector<8x32xf32>
    %87 = arith.mulf %86, %86 : vector<8x32xf32>
    %cst_35 = arith.constant dense<0.000000e+00> : vector<8xf32>
    %88 = vector.multi_reduction <add>, %87, %cst_35 [1] : vector<8x32xf32> to vector<8xf32>
    %89 = vector.shape_cast %88 : vector<8xf32> to vector<8x1xf32>
    %cst_36 = arith.constant 3.200000e+01 : f32
    %90 = vector.broadcast %cst_36 : f32 to vector<8x1xf32>
    %91 = arith.divf %89, %90 : vector<8x1xf32>
    %92 = vector.broadcast %84 : vector<8x1xf32> to vector<8x32xf32>
    %93 = arith.subf %80, %92 : vector<8x32xf32>
    %cst_37 = arith.constant 9.99999996E-13 : f32
    %94 = vector.broadcast %cst_37 : f32 to vector<8x1xf32>
    %95 = arith.addf %91, %94 : vector<8x1xf32>
    %96 = math.rsqrt %95 : vector<8x1xf32>
    %97 = vector.broadcast %96 : vector<8x1xf32> to vector<8x32xf32>
    %98 = arith.mulf %93, %97 : vector<8x32xf32>
    %c0_38 = arith.constant 0 : index
    %c0_39 = arith.constant 0 : index
    %99 = vector.load %arg10[%c0_38, %c0_39] : memref<1x32xf32, #tpu.memory_space<vmem>>, vector<1x32xf32>
    %100 = vector.broadcast %99 : vector<1x32xf32> to vector<8x32xf32>
    %101 = arith.mulf %98, %100 : vector<8x32xf32>
    %c0_40 = arith.constant 0 : index
    %c0_41 = arith.constant 0 : index
    %102 = vector.load %arg11[%c0_40, %c0_41] : memref<1x32xf32, #tpu.memory_space<vmem>>, vector<1x32xf32>
    %103 = vector.broadcast %102 : vector<1x32xf32> to vector<8x32xf32>
    %104 = arith.addf %101, %103 : vector<8x32xf32>
    %105 = arith.truncf %104 : vector<8x32xf32> to vector<8x32xbf16>
    %c0_42 = arith.constant 0 : index
    %c0_43 = arith.constant 0 : index
    %106 = vector.load %arg12[%c0_42, %c0_43] : memref<32x64xf32, #tpu.memory_space<vmem>>, vector<32x64xf32>
    %107 = arith.truncf %106 : vector<32x64xf32> to vector<32x64xbf16>
    %cst_44 = arith.constant dense<0.000000e+00> : vector<8x64xf32>
    %108 = tpu.matmul %105, %107, %cst_44 {dimension_numbers = #tpu.dot_dimension_numbers<[1], [0], [0], [1], [0, 0, 1, 1], [], []>} : vector<8x32xbf16>, vector<32x64xbf16>, vector<8x64xf32> -> vector<8x64xf32>
    %c0_45 = arith.constant 0 : index
    %c0_46 = arith.constant 0 : index
    %109 = vector.load %arg13[%c0_45, %c0_46] : memref<1x64xf32, #tpu.memory_space<vmem>>, vector<1x64xf32>
    %110 = vector.broadcast %109 : vector<1x64xf32> to vector<8x64xf32>
    %111 = arith.addf %108, %110 : vector<8x64xf32>
    %cst_47 = arith.constant 5.000000e-01 : f32
    %112 = vector.broadcast %cst_47 : f32 to vector<8x64xf32>
    %113 = arith.mulf %112, %111 : vector<8x64xf32>
    %cst_48 = arith.constant 4.471500e-02 : f32
    %114 = vector.broadcast %cst_48 : f32 to vector<8x64xf32>
    %115 = arith.mulf %114, %111 : vector<8x64xf32>
    %116 = arith.mulf %115, %111 : vector<8x64xf32>
    %117 = arith.mulf %116, %111 : vector<8x64xf32>
    %118 = arith.addf %111, %117 : vector<8x64xf32>
    %cst_49 = arith.constant 0.797884583 : f32
    %119 = vector.broadcast %cst_49 : f32 to vector<8x64xf32>
    %120 = arith.mulf %119, %118 : vector<8x64xf32>
    %121 = math.tanh %120 : vector<8x64xf32>
    %cst_50 = arith.constant 1.000000e+00 : f32
    %122 = vector.broadcast %cst_50 : f32 to vector<8x64xf32>
    %123 = arith.addf %122, %121 : vector<8x64xf32>
    %124 = arith.mulf %113, %123 : vector<8x64xf32>
    %125 = arith.truncf %124 : vector<8x64xf32> to vector<8x64xbf16>
    %c0_51 = arith.constant 0 : index
    %c0_52 = arith.constant 0 : index
    %126 = vector.load %arg14[%c0_51, %c0_52] : memref<64x32xf32, #tpu.memory_space<vmem>>, vector<64x32xf32>
    %127 = arith.truncf %126 : vector<64x32xf32> to vector<64x32xbf16>
    %cst_53 = arith.constant dense<0.000000e+00> : vector<8x32xf32>
    %128 = tpu.matmul %125, %127, %cst_53 {dimension_numbers = #tpu.dot_dimension_numbers<[1], [0], [0], [1], [0, 0, 1, 1], [], []>} : vector<8x64xbf16>, vector<64x32xbf16>, vector<8x32xf32> -> vector<8x32xf32>
    %c0_54 = arith.constant 0 : index
    %c0_55 = arith.constant 0 : index
    %129 = vector.load %arg15[%c0_54, %c0_55] : memref<1x32xf32, #tpu.memory_space<vmem>>, vector<1x32xf32>
    %130 = vector.broadcast %129 : vector<1x32xf32> to vector<8x32xf32>
    %131 = arith.addf %128, %130 : vector<8x32xf32>
    %132 = arith.addf %131, %104 : vector<8x32xf32>
    %cst_56 = arith.constant dense<0.000000e+00> : vector<8xf32>
    %133 = vector.multi_reduction <add>, %132, %cst_56 [1] : vector<8x32xf32> to vector<8xf32>
    %134 = vector.shape_cast %133 : vector<8xf32> to vector<8x1xf32>
    %cst_57 = arith.constant 3.200000e+01 : f32
    %135 = vector.broadcast %cst_57 : f32 to vector<8x1xf32>
    %136 = arith.divf %134, %135 : vector<8x1xf32>
    %137 = vector.broadcast %136 : vector<8x1xf32> to vector<8x32xf32>
    %138 = arith.subf %132, %137 : vector<8x32xf32>
    %139 = arith.mulf %138, %138 : vector<8x32xf32>
    %cst_58 = arith.constant dense<0.000000e+00> : vector<8xf32>
    %140 = vector.multi_reduction <add>, %139, %cst_58 [1] : vector<8x32xf32> to vector<8xf32>
    %141 = vector.shape_cast %140 : vector<8xf32> to vector<8x1xf32>
    %cst_59 = arith.constant 3.200000e+01 : f32
    %142 = vector.broadcast %cst_59 : f32 to vector<8x1xf32>
    %143 = arith.divf %141, %142 : vector<8x1xf32>
    %144 = vector.broadcast %136 : vector<8x1xf32> to vector<8x32xf32>
    %145 = arith.subf %132, %144 : vector<8x32xf32>
    %cst_60 = arith.constant 9.99999996E-13 : f32
    %146 = vector.broadcast %cst_60 : f32 to vector<8x1xf32>
    %147 = arith.addf %143, %146 : vector<8x1xf32>
    %148 = math.rsqrt %147 : vector<8x1xf32>
    %149 = vector.broadcast %148 : vector<8x1xf32> to vector<8x32xf32>
    %150 = arith.mulf %145, %149 : vector<8x32xf32>
    %c0_61 = arith.constant 0 : index
    %c0_62 = arith.constant 0 : index
    %151 = vector.load %arg16[%c0_61, %c0_62] : memref<1x32xf32, #tpu.memory_space<vmem>>, vector<1x32xf32>
    %152 = vector.broadcast %151 : vector<1x32xf32> to vector<8x32xf32>
    %153 = arith.mulf %150, %152 : vector<8x32xf32>
    %c0_63 = arith.constant 0 : index
    %c0_64 = arith.constant 0 : index
    %154 = vector.load %arg17[%c0_63, %c0_64] : memref<1x32xf32, #tpu.memory_space<vmem>>, vector<1x32xf32>
    %155 = vector.broadcast %154 : vector<1x32xf32> to vector<8x32xf32>
    %156 = arith.addf %153, %155 : vector<8x32xf32>
    %c0_65 = arith.constant 0 : index
    %c0_66 = arith.constant 0 : index
    %c0_67 = arith.constant 0 : index
    %157 = vector.load %arg19[%c0_65, %c0_66, %c0_67] : memref<1x8x32xf32, #tpu.memory_space<vmem>>, vector<1x8x32xf32>
    %158 = vector.shape_cast %157 : vector<1x8x32xf32> to vector<8x32xf32>
    %159 = vector.shape_cast %104 : vector<8x32xf32> to vector<1x8x32xf32>
    tpu.vector_store %arg19[%c0_65, %c0_66, %c0_67], %159 {strides = array<i32>} : memref<1x8x32xf32, #tpu.memory_space<vmem>>, vector<1x8x32xf32>,
    %c0_68 = arith.constant 0 : index
    %c0_69 = arith.constant 0 : index
    %c0_70 = arith.constant 0 : index
    %160 = vector.load %arg18[%c0_68, %c0_69, %c0_70] : memref<1x8x32xf32, #tpu.memory_space<vmem>>, vector<1x8x32xf32>
    %161 = vector.shape_cast %160 : vector<1x8x32xf32> to vector<8x32xf32>
    %162 = vector.shape_cast %156 : vector<8x32xf32> to vector<1x8x32xf32>
    tpu.vector_store %arg18[%c0_68, %c0_69, %c0_70], %162 {strides = array<i32>} : memref<1x8x32xf32, #tpu.memory_space<vmem>>, vector<1x8x32xf32>,
    return
  }
  func.func @transform_0(%arg0: i32) -> (i32, i32, i32) {
    %c0_i32 = arith.constant 0 : i32
    %c0_i32_0 = arith.constant 0 : i32
    %c0_i32_1 = arith.constant 0 : i32
    return %arg0, %c0_i32, %c0_i32_0 : i32, i32, i32
  }
  func.func @transform_1(%arg0: i32) -> (i32, i32, i32) {
    %c0_i32 = arith.constant 0 : i32
    %c0_i32_0 = arith.constant 0 : i32
    %c0_i32_1 = arith.constant 0 : i32
    return %arg0, %c0_i32, %c0_i32_0 : i32, i32, i32
  }
  func.func @transform_2(%arg0: i32) -> (i32, i32) {
    %c0_i32 = arith.constant 0 : i32
    %c0_i32_0 = arith.constant 0 : i32
    %c0_i32_1 = arith.constant 0 : i32
    return %c0_i32, %c0_i32_0 : i32, i32
  }
  func.func @transform_3(%arg0: i32) -> (i32, i32) {
    %c0_i32 = arith.constant 0 : i32
    %c0_i32_0 = arith.constant 0 : i32
    %c0_i32_1 = arith.constant 0 : i32
    return %c0_i32, %c0_i32_0 : i32, i32
  }
  func.func @transform_4(%arg0: i32) -> (i32, i32) {
    %c0_i32 = arith.constant 0 : i32
    %c0_i32_0 = arith.constant 0 : i32
    %c0_i32_1 = arith.constant 0 : i32
    return %c0_i32, %c0_i32_0 : i32, i32
  }
  func.func @transform_5(%arg0: i32) -> (i32, i32) {
    %c0_i32 = arith.constant 0 : i32
    %c0_i32_0 = arith.constant 0 : i32
    %c0_i32_1 = arith.constant 0 : i32
    return %c0_i32, %c0_i32_0 : i32, i32
  }
  func.func @transform_6(%arg0: i32) -> (i32, i32) {
    %c0_i32 = arith.constant 0 : i32
    %c0_i32_0 = arith.constant 0 : i32
    %c0_i32_1 = arith.constant 0 : i32
    return %c0_i32, %c0_i32_0 : i32, i32
  }
  func.func @transform_7(%arg0: i32) -> (i32, i32) {
    %c0_i32 = arith.constant 0 : i32
    %c0_i32_0 = arith.constant 0 : i32
    %c0_i32_1 = arith.constant 0 : i32
    return %c0_i32, %c0_i32_0 : i32, i32
  }
  func.func @transform_8(%arg0: i32) -> (i32, i32) {
    %c0_i32 = arith.constant 0 : i32
    %c0_i32_0 = arith.constant 0 : i32
    %c0_i32_1 = arith.constant 0 : i32
    return %c0_i32, %c0_i32_0 : i32, i32
  }
  func.func @transform_9(%arg0: i32) -> (i32, i32) {
    %c0_i32 = arith.constant 0 : i32
    %c0_i32_0 = arith.constant 0 : i32
    %c0_i32_1 = arith.constant 0 : i32
    return %c0_i32, %c0_i32_0 : i32, i32
  }
  func.func @transform_10(%arg0: i32) -> (i32, i32) {
    %c0_i32 = arith.constant 0 : i32
    %c0_i32_0 = arith.constant 0 : i32
    %c0_i32_1 = arith.constant 0 : i32
    return %c0_i32, %c0_i32_0 : i32, i32
  }
  func.func @transform_11(%arg0: i32) -> (i32, i32) {
    %c0_i32 = arith.constant 0 : i32
    %c0_i32_0 = arith.constant 0 : i32
    %c0_i32_1 = arith.constant 0 : i32
    return %c0_i32, %c0_i32_0 : i32, i32
  }
  func.func @transform_12(%arg0: i32) -> (i32, i32) {
    %c0_i32 = arith.constant 0 : i32
    %c0_i32_0 = arith.constant 0 : i32
    %c0_i32_1 = arith.constant 0 : i32
    return %c0_i32, %c0_i32_0 : i32, i32
  }
  func.func @transform_13(%arg0: i32) -> (i32, i32) {
    %c0_i32 = arith.constant 0 : i32
    %c0_i32_0 = arith.constant 0 : i32
    %c0_i32_1 = arith.constant 0 : i32
    return %c0_i32, %c0_i32_0 : i32, i32
  }
  func.func @transform_14(%arg0: i32) -> (i32, i32) {
    %c0_i32 = arith.constant 0 : i32
    %c0_i32_0 = arith.constant 0 : i32
    %c0_i32_1 = arith.constant 0 : i32
    return %c0_i32, %c0_i32_0 : i32, i32
  }
  func.func @transform_15(%arg0: i32) -> (i32, i32) {
    %c0_i32 = arith.constant 0 : i32
    %c0_i32_0 = arith.constant 0 : i32
    %c0_i32_1 = arith.constant 0 : i32
    return %c0_i32, %c0_i32_0 : i32, i32
  }
  func.func @transform_16(%arg0: i32) -> (i32, i32) {
    %c0_i32 = arith.constant 0 : i32
    %c0_i32_0 = arith.constant 0 : i32
    %c0_i32_1 = arith.constant 0 : i32
    return %c0_i32, %c0_i32_0 : i32, i32
  }
  func.func @transform_17(%arg0: i32) -> (i32, i32, i32) {
    %c0_i32 = arith.constant 0 : i32
    %c0_i32_0 = arith.constant 0 : i32
    %c0_i32_1 = arith.constant 0 : i32
    return %arg0, %c0_i32, %c0_i32_0 : i32, i32, i32
  }
  func.func @transform_18(%arg0: i32) -> (i32, i32, i32) {
    %c0_i32 = arith.constant 0 : i32
    %c0_i32_0 = arith.constant 0 : i32
    %c0_i32_1 = arith.constant 0 : i32
    return %arg0, %c0_i32, %c0_i32_0 : i32, i32, i32
  }
}

module attributes {stable_mosaic.version = 11 : i64} {
  func.func @_fused_layer_kernel(%arg0: i32, %arg1: memref<1x1x8xf32, #tpu.memory_space<vmem>>, %arg2: memref<1x8x32xf32, #tpu.memory_space<vmem>>, %arg3: memref<8x32xf32, #tpu.memory_space<vmem>>, %arg4: memref<1x32xf32, #tpu.memory_space<vmem>>, %arg5: memref<1x32xf32, #tpu.memory_space<vmem>>, %arg6: memref<32x96xf32, #tpu.memory_space<vmem>>, %arg7: memref<1x96xf32, #tpu.memory_space<vmem>>, %arg8: memref<32x32xf32, #tpu.memory_space<vmem>>, %arg9: memref<1x32xf32, #tpu.memory_space<vmem>>, %arg10: memref<1x32xf32, #tpu.memory_space<vmem>>, %arg11: memref<1x32xf32, #tpu.memory_space<vmem>>, %arg12: memref<32x64xf32, #tpu.memory_space<vmem>>, %arg13: memref<1x64xf32, #tpu.memory_space<vmem>>, %arg14: memref<64x32xf32, #tpu.memory_space<vmem>>, %arg15: memref<1x32xf32, #tpu.memory_space<vmem>>, %arg16: memref<1x32xf32, #tpu.memory_space<vmem>>, %arg17: memref<1x32xf32, #tpu.memory_space<vmem>>, %arg18: memref<1x8x32xf32, #tpu.memory_space<vmem>>, %arg19: memref<1x8x32xf32, #tpu.memory_space<vmem>>, %arg20: memref<8x32xf32, #tpu.memory_space<vmem>>) attributes {dimension_semantics = [#tpu.dimension_semantics<parallel>], iteration_bounds = array<i64: 2>, scalar_prefetch = 0 : i64, scratch_operands = 1 : i64, tpu.core_type = #tpu.core_type<tc>, window_params = [{transform_indices = @transform_0, window_bounds = array<i64: 1, 1, 8>}, {transform_indices = @transform_1, window_bounds = array<i64: 1, 8, 32>}, {pipeline_mode = #tpu.pipeline_mode<synchronous>, transform_indices = @transform_2, window_bounds = array<i64: 8, 32>}, {pipeline_mode = #tpu.pipeline_mode<synchronous>, transform_indices = @transform_3, window_bounds = array<i64: 1, 32>}, {pipeline_mode = #tpu.pipeline_mode<synchronous>, transform_indices = @transform_4, window_bounds = array<i64: 1, 32>}, {pipeline_mode = #tpu.pipeline_mode<synchronous>, transform_indices = @transform_5, window_bounds = array<i64: 32, 96>}, {pipeline_mode = #tpu.pipeline_mode<synchronous>, transform_indices = @transform_6, window_bounds = array<i64: 1, 96>}, {pipeline_mode = #tpu.pipeline_mode<synchronous>, transform_indices = @transform_7, window_bounds = array<i64: 32, 32>}, {pipeline_mode = #tpu.pipeline_mode<synchronous>, transform_indices = @transform_8, window_bounds = array<i64: 1, 32>}, {pipeline_mode = #tpu.pipeline_mode<synchronous>, transform_indices = @transform_9, window_bounds = array<i64: 1, 32>}, {pipeline_mode = #tpu.pipeline_mode<synchronous>, transform_indices = @transform_10, window_bounds = array<i64: 1, 32>}, {pipeline_mode = #tpu.pipeline_mode<synchronous>, transform_indices = @transform_11, window_bounds = array<i64: 32, 64>}, {pipeline_mode = #tpu.pipeline_mode<synchronous>, transform_indices = @transform_12, window_bounds = array<i64: 1, 64>}, {pipeline_mode = #tpu.pipeline_mode<synchronous>, transform_indices = @transform_13, window_bounds = array<i64: 64, 32>}, {pipeline_mode = #tpu.pipeline_mode<synchronous>, transform_indices = @transform_14, window_bounds = array<i64: 1, 32>}, {pipeline_mode = #tpu.pipeline_mode<synchronous>, transform_indices = @transform_15, window_bounds = array<i64: 1, 32>}, {pipeline_mode = #tpu.pipeline_mode<synchronous>, transform_indices = @transform_16, window_bounds = array<i64: 1, 32>}, {transform_indices = @transform_17, window_bounds = array<i64: 1, 8, 32>}, {transform_indices = @transform_18, window_bounds = array<i64: 1, 8, 32>}]} {
    %c0 = arith.constant 0 : index
    %c0_0 = arith.constant 0 : index
    %c0_1 = arith.constant 0 : index
    %0 = vector.load %arg2[%c0, %c0_0, %c0_1] : memref<1x8x32xf32, #tpu.memory_space<vmem>>, vector<1x8x32xf32>
    %1 = vector.shape_cast %0 : vector<1x8x32xf32> to vector<8x32xf32>
    %cst = arith.constant dense<0.000000e+00> : vector<8xf32>
    %2 = vector.multi_reduction <add>, %1, %cst [1] : vector<8x32xf32> to vector<8xf32>
    %3 = vector.shape_cast %2 : vector<8xf32> to vector<8x1xf32>
    %cst_2 = arith.constant 3.200000e+01 : f32
    %4 = vector.broadcast %cst_2 : f32 to vector<8x1xf32>
    %5 = arith.divf %3, %4 : vector<8x1xf32>
    %6 = vector.broadcast %5 : vector<8x1xf32> to vector<8x32xf32>
    %7 = arith.subf %1, %6 : vector<8x32xf32>
    %8 = arith.mulf %7, %7 : vector<8x32xf32>
    %cst_3 = arith.constant dense<0.000000e+00> : vector<8xf32>
    %9 = vector.multi_reduction <add>, %8, %cst_3 [1] : vector<8x32xf32> to vector<8xf32>
    %10 = vector.shape_cast %9 : vector<8xf32> to vector<8x1xf32>
    %cst_4 = arith.constant 3.200000e+01 : f32
    %11 = vector.broadcast %cst_4 : f32 to vector<8x1xf32>
    %12 = arith.divf %10, %11 : vector<8x1xf32>
    %13 = vector.broadcast %5 : vector<8x1xf32> to vector<8x32xf32>
    %14 = arith.subf %1, %13 : vector<8x32xf32>
    %cst_5 = arith.constant 9.99999996E-13 : f32
    %15 = vector.broadcast %cst_5 : f32 to vector<8x1xf32>
    %16 = arith.addf %12, %15 : vector<8x1xf32>
    %17 = math.rsqrt %16 : vector<8x1xf32>
    %18 = vector.broadcast %17 : vector<8x1xf32> to vector<8x32xf32>
    %19 = arith.mulf %14, %18 : vector<8x32xf32>
    %c0_6 = arith.constant 0 : index
    %c0_7 = arith.constant 0 : index
    %20 = vector.load %arg4[%c0_6, %c0_7] : memref<1x32xf32, #tpu.memory_space<vmem>>, vector<1x32xf32>
    %21 = vector.broadcast %20 : vector<1x32xf32> to vector<8x32xf32>
    %22 = arith.mulf %19, %21 : vector<8x32xf32>
    %c0_8 = arith.constant 0 : index
    %c0_9 = arith.constant 0 : index
    %23 = vector.load %arg5[%c0_8, %c0_9] : memref<1x32xf32, #tpu.memory_space<vmem>>, vector<1x32xf32>
    %24 = vector.broadcast %23 : vector<1x32xf32> to vector<8x32xf32>
    %25 = arith.addf %22, %24 : vector<8x32xf32>
    %c0_10 = arith.constant 0 : index
    %c0_11 = arith.constant 0 : index
    %26 = vector.load %arg3[%c0_10, %c0_11] : memref<8x32xf32, #tpu.memory_space<vmem>>, vector<8x32xf32>
    %27 = arith.addf %25, %26 : vector<8x32xf32>
    %28 = arith.truncf %27 : vector<8x32xf32> to vector<8x32xbf16>
    %c0_12 = arith.constant 0 : index
    %c0_13 = arith.constant 0 : index
    %29 = vector.load %arg6[%c0_12, %c0_13] : memref<32x96xf32, #tpu.memory_space<vmem>>, vector<32x96xf32>
    %30 = arith.truncf %29 : vector<32x96xf32> to vector<32x96xbf16>
    %cst_14 = arith.constant dense<0.000000e+00> : vector<8x96xf32>
    %31 = tpu.matmul %28, %30, %cst_14 {dimension_numbers = #tpu.dot_dimension_numbers<[1], [0], [0], [1], [0, 0, 1, 1], [], []>} : vector<8x32xbf16>, vector<32x96xbf16>, vector<8x96xf32> -> vector<8x96xf32>
    %c0_15 = arith.constant 0 : index
    %c0_16 = arith.constant 0 : index
    %32 = vector.load %arg7[%c0_15, %c0_16] : memref<1x96xf32, #tpu.memory_space<vmem>>, vector<1x96xf32>
    %33 = vector.broadcast %32 : vector<1x96xf32> to vector<8x96xf32>
    %34 = arith.addf %31, %33 : vector<8x96xf32>
    %c0_17 = arith.constant 0 : index
    %c0_18 = arith.constant 0 : index
    %c0_19 = arith.constant 0 : index
    %35 = vector.load %arg1[%c0_17, %c0_18, %c0_19] : memref<1x1x8xf32, #tpu.memory_space<vmem>>, vector<1x1x8xf32>
    %36 = vector.shape_cast %35 : vector<1x1x8xf32> to vector<1x8xf32>
    %37 = tpu.iota {dimensions = array<i32: 0>} : vector<8x8xi32>
    %38 = tpu.iota {dimensions = array<i32: 1>} : vector<8x8xi32>
    %39 = arith.cmpi sle, %38, %37 : vector<8x8xi32>
    %40 = arith.extui %39 : vector<8x8xi1> to vector<8x8xi32>
    %41 = arith.sitofp %40 : vector<8x8xi32> to vector<8x8xf32>
    %42 = vector.broadcast %36 : vector<1x8xf32> to vector<8x8xf32>
    %43 = arith.mulf %41, %42 : vector<8x8xf32>
    %cst_20 = arith.constant 1.000000e+00 : f32
    %44 = vector.broadcast %cst_20 : f32 to vector<8x8xf32>
    %45 = arith.subf %44, %43 : vector<8x8xf32>
    %cst_21 = arith.constant -1.000000e+04 : f32
    %46 = vector.broadcast %cst_21 : f32 to vector<8x8xf32>
    %47 = arith.mulf %45, %46 : vector<8x8xf32>
    %48 = vector.extract_strided_slice %34 {offsets = [0, 0], sizes = [8, 16], strides = [1, 1]} : vector<8x96xf32> to vector<8x16xf32>
    %49 = vector.extract_strided_slice %34 {offsets = [0, 32], sizes = [8, 16], strides = [1, 1]} : vector<8x96xf32> to vector<8x16xf32>
    %50 = vector.extract_strided_slice %34 {offsets = [0, 64], sizes = [8, 16], strides = [1, 1]} : vector<8x96xf32> to vector<8x16xf32>
    %51 = arith.truncf %48 : vector<8x16xf32> to vector<8x16xbf16>
    %52 = arith.truncf %49 : vector<8x16xf32> to vector<8x16xbf16>
    %53 = tpu.transpose %52, [1, 0] : vector<8x16xbf16> -> vector<16x8xbf16>
    %cst_22 = arith.constant dense<0.000000e+00> : vector<8x8xf32>
    %54 = tpu.matmul %51, %53, %cst_22 {dimension_numbers = #tpu.dot_dimension_numbers<[1], [0], [0], [1], [0, 0, 1, 1], [], []>} : vector<8x16xbf16>, vector<16x8xbf16>, vector<8x8xf32> -> vector<8x8xf32>
    %cst_23 = arith.constant 2.500000e-01 : f32
    %55 = vector.broadcast %cst_23 : f32 to vector<8x8xf32>
    %56 = arith.mulf %54, %55 : vector<8x8xf32>
    %57 = arith.addf %56, %47 : vector<8x8xf32>
    %cst_24 = arith.constant dense<0xFF800000> : vector<8xf32>
    %58 = vector.multi_reduction <maximumf>, %57, %cst_24 [1] : vector<8x8xf32> to vector<8xf32>
    %59 = vector.shape_cast %58 : vector<8xf32> to vector<8x1xf32>
    %60 = vector.broadcast %59 : vector<8x1xf32> to vector<8x8xf32>
    %61 = arith.subf %57, %60 : vector<8x8xf32>
    %62 = math.exp %61 : vector<8x8xf32>
    %cst_25 = arith.constant dense<0.000000e+00> : vector<8xf32>
    %63 = vector.multi_reduction <add>, %62, %cst_25 [1] : vector<8x8xf32> to vector<8xf32>
    %64 = vector.shape_cast %63 : vector<8xf32> to vector<8x1xf32>
    %65 = tpu.reciprocal %64 {approx = true} : vector<8x1xf32> -> vector<8x1xf32>
    %66 = vector.broadcast %65 : vector<8x1xf32> to vector<8x8xf32>
    %67 = arith.mulf %62, %66 : vector<8x8xf32>
    %68 = arith.truncf %67 : vector<8x8xf32> to vector<8x8xbf16>
    %69 = arith.truncf %50 : vector<8x16xf32> to vector<8x16xbf16>
    %cst_26 = arith.constant dense<0.000000e+00> : vector<8x16xf32>
    %70 = tpu.matmul %68, %69, %cst_26 {dimension_numbers = #tpu.dot_dimension_numbers<[1], [0], [0], [1], [0, 0, 1, 1], [], []>} : vector<8x8xbf16>, vector<8x16xbf16>, vector<8x16xf32> -> vector<8x16xf32>
    %c0_27 = arith.constant 0 : index
    %c0_28 = arith.constant 0 : index
    %71 = vector.load %arg20[%c0_27, %c0_28] : memref<8x32xf32, #tpu.memory_space<vmem>>, vector<8x16xf32>
    tpu.vector_store %arg20[%c0_27, %c0_28], %70 {strides = array<i32>} : memref<8x32xf32, #tpu.memory_space<vmem>>, vector<8x16xf32>,
    %72 = vector.extract_strided_slice %34 {offsets = [0, 16], sizes = [8, 16], strides = [1, 1]} : vector<8x96xf32> to vector<8x16xf32>
    %73 = vector.extract_strided_slice %34 {offsets = [0, 48], sizes = [8, 16], strides = [1, 1]} : vector<8x96xf32> to vector<8x16xf32>
    %74 = vector.extract_strided_slice %34 {offsets = [0, 80], sizes = [8, 16], strides = [1, 1]} : vector<8x96xf32> to vector<8x16xf32>
    %75 = arith.truncf %72 : vector<8x16xf32> to vector<8x16xbf16>
    %76 = arith.truncf %73 : vector<8x16xf32> to vector<8x16xbf16>
    %77 = tpu.transpose %76, [1, 0] : vector<8x16xbf16> -> vector<16x8xbf16>
    %cst_29 = arith.constant dense<0.000000e+00> : vector<8x8xf32>
    %78 = tpu.matmul %75, %77, %cst_29 {dimension_numbers = #tpu.dot_dimension_numbers<[1], [0], [0], [1], [0, 0, 1, 1], [], []>} : vector<8x16xbf16>, vector<16x8xbf16>, vector<8x8xf32> -> vector<8x8xf32>
    %cst_30 = arith.constant 2.500000e-01 : f32
    %79 = vector.broadcast %cst_30 : f32 to vector<8x8xf32>
    %80 = arith.mulf %78, %79 : vector<8x8xf32>
    %81 = arith.addf %80, %47 : vector<8x8xf32>
    %cst_31 = arith.constant dense<0xFF800000> : vector<8xf32>
    %82 = vector.multi_reduction <maximumf>, %81, %cst_31 [1] : vector<8x8xf32> to vector<8xf32>
    %83 = vector.shape_cast %82 : vector<8xf32> to vector<8x1xf32>
    %84 = vector.broadcast %83 : vector<8x1xf32> to vector<8x8xf32>
    %85 = arith.subf %81, %84 : vector<8x8xf32>
    %86 = math.exp %85 : vector<8x8xf32>
    %cst_32 = arith.constant dense<0.000000e+00> : vector<8xf32>
    %87 = vector.multi_reduction <add>, %86, %cst_32 [1] : vector<8x8xf32> to vector<8xf32>
    %88 = vector.shape_cast %87 : vector<8xf32> to vector<8x1xf32>
    %89 = tpu.reciprocal %88 {approx = true} : vector<8x1xf32> -> vector<8x1xf32>
    %90 = vector.broadcast %89 : vector<8x1xf32> to vector<8x8xf32>
    %91 = arith.mulf %86, %90 : vector<8x8xf32>
    %92 = arith.truncf %91 : vector<8x8xf32> to vector<8x8xbf16>
    %93 = arith.truncf %74 : vector<8x16xf32> to vector<8x16xbf16>
    %cst_33 = arith.constant dense<0.000000e+00> : vector<8x16xf32>
    %94 = tpu.matmul %92, %93, %cst_33 {dimension_numbers = #tpu.dot_dimension_numbers<[1], [0], [0], [1], [0, 0, 1, 1], [], []>} : vector<8x8xbf16>, vector<8x16xbf16>, vector<8x16xf32> -> vector<8x16xf32>
    %c0_34 = arith.constant 0 : index
    %c16 = arith.constant 16 : index
    %95 = vector.load %arg20[%c0_34, %c16] : memref<8x32xf32, #tpu.memory_space<vmem>>, vector<8x16xf32>
    tpu.vector_store %arg20[%c0_34, %c16], %94 {strides = array<i32>} : memref<8x32xf32, #tpu.memory_space<vmem>>, vector<8x16xf32>,
    %c0_35 = arith.constant 0 : index
    %c0_36 = arith.constant 0 : index
    %96 = vector.load %arg20[%c0_35, %c0_36] : memref<8x32xf32, #tpu.memory_space<vmem>>, vector<8x32xf32>
    %97 = arith.truncf %96 : vector<8x32xf32> to vector<8x32xbf16>
    %c0_37 = arith.constant 0 : index
    %c0_38 = arith.constant 0 : index
    %98 = vector.load %arg8[%c0_37, %c0_38] : memref<32x32xf32, #tpu.memory_space<vmem>>, vector<32x32xf32>
    %99 = arith.truncf %98 : vector<32x32xf32> to vector<32x32xbf16>
    %cst_39 = arith.constant dense<0.000000e+00> : vector<8x32xf32>
    %100 = tpu.matmul %97, %99, %cst_39 {dimension_numbers = #tpu.dot_dimension_numbers<[1], [0], [0], [1], [0, 0, 1, 1], [], []>} : vector<8x32xbf16>, vector<32x32xbf16>, vector<8x32xf32> -> vector<8x32xf32>
    %c0_40 = arith.constant 0 : index
    %c0_41 = arith.constant 0 : index
    %101 = vector.load %arg9[%c0_40, %c0_41] : memref<1x32xf32, #tpu.memory_space<vmem>>, vector<1x32xf32>
    %102 = vector.broadcast %101 : vector<1x32xf32> to vector<8x32xf32>
    %103 = arith.addf %100, %102 : vector<8x32xf32>
    %104 = arith.addf %103, %25 : vector<8x32xf32>
    %cst_42 = arith.constant dense<0.000000e+00> : vector<8xf32>
    %105 = vector.multi_reduction <add>, %104, %cst_42 [1] : vector<8x32xf32> to vector<8xf32>
    %106 = vector.shape_cast %105 : vector<8xf32> to vector<8x1xf32>
    %cst_43 = arith.constant 3.200000e+01 : f32
    %107 = vector.broadcast %cst_43 : f32 to vector<8x1xf32>
    %108 = arith.divf %106, %107 : vector<8x1xf32>
    %109 = vector.broadcast %108 : vector<8x1xf32> to vector<8x32xf32>
    %110 = arith.subf %104, %109 : vector<8x32xf32>
    %111 = arith.mulf %110, %110 : vector<8x32xf32>
    %cst_44 = arith.constant dense<0.000000e+00> : vector<8xf32>
    %112 = vector.multi_reduction <add>, %111, %cst_44 [1] : vector<8x32xf32> to vector<8xf32>
    %113 = vector.shape_cast %112 : vector<8xf32> to vector<8x1xf32>
    %cst_45 = arith.constant 3.200000e+01 : f32
    %114 = vector.broadcast %cst_45 : f32 to vector<8x1xf32>
    %115 = arith.divf %113, %114 : vector<8x1xf32>
    %116 = vector.broadcast %108 : vector<8x1xf32> to vector<8x32xf32>
    %117 = arith.subf %104, %116 : vector<8x32xf32>
    %cst_46 = arith.constant 9.99999996E-13 : f32
    %118 = vector.broadcast %cst_46 : f32 to vector<8x1xf32>
    %119 = arith.addf %115, %118 : vector<8x1xf32>
    %120 = math.rsqrt %119 : vector<8x1xf32>
    %121 = vector.broadcast %120 : vector<8x1xf32> to vector<8x32xf32>
    %122 = arith.mulf %117, %121 : vector<8x32xf32>
    %c0_47 = arith.constant 0 : index
    %c0_48 = arith.constant 0 : index
    %123 = vector.load %arg10[%c0_47, %c0_48] : memref<1x32xf32, #tpu.memory_space<vmem>>, vector<1x32xf32>
    %124 = vector.broadcast %123 : vector<1x32xf32> to vector<8x32xf32>
    %125 = arith.mulf %122, %124 : vector<8x32xf32>
    %c0_49 = arith.constant 0 : index
    %c0_50 = arith.constant 0 : index
    %126 = vector.load %arg11[%c0_49, %c0_50] : memref<1x32xf32, #tpu.memory_space<vmem>>, vector<1x32xf32>
    %127 = vector.broadcast %126 : vector<1x32xf32> to vector<8x32xf32>
    %128 = arith.addf %125, %127 : vector<8x32xf32>
    %129 = arith.truncf %128 : vector<8x32xf32> to vector<8x32xbf16>
    %c0_51 = arith.constant 0 : index
    %c0_52 = arith.constant 0 : index
    %130 = vector.load %arg12[%c0_51, %c0_52] : memref<32x64xf32, #tpu.memory_space<vmem>>, vector<32x64xf32>
    %131 = arith.truncf %130 : vector<32x64xf32> to vector<32x64xbf16>
    %cst_53 = arith.constant dense<0.000000e+00> : vector<8x64xf32>
    %132 = tpu.matmul %129, %131, %cst_53 {dimension_numbers = #tpu.dot_dimension_numbers<[1], [0], [0], [1], [0, 0, 1, 1], [], []>} : vector<8x32xbf16>, vector<32x64xbf16>, vector<8x64xf32> -> vector<8x64xf32>
    %c0_54 = arith.constant 0 : index
    %c0_55 = arith.constant 0 : index
    %133 = vector.load %arg13[%c0_54, %c0_55] : memref<1x64xf32, #tpu.memory_space<vmem>>, vector<1x64xf32>
    %134 = vector.broadcast %133 : vector<1x64xf32> to vector<8x64xf32>
    %135 = arith.addf %132, %134 : vector<8x64xf32>
    %cst_56 = arith.constant 5.000000e-01 : f32
    %136 = vector.broadcast %cst_56 : f32 to vector<8x64xf32>
    %137 = arith.mulf %136, %135 : vector<8x64xf32>
    %cst_57 = arith.constant 4.471500e-02 : f32
    %138 = vector.broadcast %cst_57 : f32 to vector<8x64xf32>
    %139 = arith.mulf %138, %135 : vector<8x64xf32>
    %140 = arith.mulf %139, %135 : vector<8x64xf32>
    %141 = arith.mulf %140, %135 : vector<8x64xf32>
    %142 = arith.addf %135, %141 : vector<8x64xf32>
    %cst_58 = arith.constant 0.797884583 : f32
    %143 = vector.broadcast %cst_58 : f32 to vector<8x64xf32>
    %144 = arith.mulf %143, %142 : vector<8x64xf32>
    %145 = math.tanh %144 : vector<8x64xf32>
    %cst_59 = arith.constant 1.000000e+00 : f32
    %146 = vector.broadcast %cst_59 : f32 to vector<8x64xf32>
    %147 = arith.addf %146, %145 : vector<8x64xf32>
    %148 = arith.mulf %137, %147 : vector<8x64xf32>
    %149 = arith.truncf %148 : vector<8x64xf32> to vector<8x64xbf16>
    %c0_60 = arith.constant 0 : index
    %c0_61 = arith.constant 0 : index
    %150 = vector.load %arg14[%c0_60, %c0_61] : memref<64x32xf32, #tpu.memory_space<vmem>>, vector<64x32xf32>
    %151 = arith.truncf %150 : vector<64x32xf32> to vector<64x32xbf16>
    %cst_62 = arith.constant dense<0.000000e+00> : vector<8x32xf32>
    %152 = tpu.matmul %149, %151, %cst_62 {dimension_numbers = #tpu.dot_dimension_numbers<[1], [0], [0], [1], [0, 0, 1, 1], [], []>} : vector<8x64xbf16>, vector<64x32xbf16>, vector<8x32xf32> -> vector<8x32xf32>
    %c0_63 = arith.constant 0 : index
    %c0_64 = arith.constant 0 : index
    %153 = vector.load %arg15[%c0_63, %c0_64] : memref<1x32xf32, #tpu.memory_space<vmem>>, vector<1x32xf32>
    %154 = vector.broadcast %153 : vector<1x32xf32> to vector<8x32xf32>
    %155 = arith.addf %152, %154 : vector<8x32xf32>
    %156 = arith.addf %155, %128 : vector<8x32xf32>
    %cst_65 = arith.constant dense<0.000000e+00> : vector<8xf32>
    %157 = vector.multi_reduction <add>, %156, %cst_65 [1] : vector<8x32xf32> to vector<8xf32>
    %158 = vector.shape_cast %157 : vector<8xf32> to vector<8x1xf32>
    %cst_66 = arith.constant 3.200000e+01 : f32
    %159 = vector.broadcast %cst_66 : f32 to vector<8x1xf32>
    %160 = arith.divf %158, %159 : vector<8x1xf32>
    %161 = vector.broadcast %160 : vector<8x1xf32> to vector<8x32xf32>
    %162 = arith.subf %156, %161 : vector<8x32xf32>
    %163 = arith.mulf %162, %162 : vector<8x32xf32>
    %cst_67 = arith.constant dense<0.000000e+00> : vector<8xf32>
    %164 = vector.multi_reduction <add>, %163, %cst_67 [1] : vector<8x32xf32> to vector<8xf32>
    %165 = vector.shape_cast %164 : vector<8xf32> to vector<8x1xf32>
    %cst_68 = arith.constant 3.200000e+01 : f32
    %166 = vector.broadcast %cst_68 : f32 to vector<8x1xf32>
    %167 = arith.divf %165, %166 : vector<8x1xf32>
    %168 = vector.broadcast %160 : vector<8x1xf32> to vector<8x32xf32>
    %169 = arith.subf %156, %168 : vector<8x32xf32>
    %cst_69 = arith.constant 9.99999996E-13 : f32
    %170 = vector.broadcast %cst_69 : f32 to vector<8x1xf32>
    %171 = arith.addf %167, %170 : vector<8x1xf32>
    %172 = math.rsqrt %171 : vector<8x1xf32>
    %173 = vector.broadcast %172 : vector<8x1xf32> to vector<8x32xf32>
    %174 = arith.mulf %169, %173 : vector<8x32xf32>
    %c0_70 = arith.constant 0 : index
    %c0_71 = arith.constant 0 : index
    %175 = vector.load %arg16[%c0_70, %c0_71] : memref<1x32xf32, #tpu.memory_space<vmem>>, vector<1x32xf32>
    %176 = vector.broadcast %175 : vector<1x32xf32> to vector<8x32xf32>
    %177 = arith.mulf %174, %176 : vector<8x32xf32>
    %c0_72 = arith.constant 0 : index
    %c0_73 = arith.constant 0 : index
    %178 = vector.load %arg17[%c0_72, %c0_73] : memref<1x32xf32, #tpu.memory_space<vmem>>, vector<1x32xf32>
    %179 = vector.broadcast %178 : vector<1x32xf32> to vector<8x32xf32>
    %180 = arith.addf %177, %179 : vector<8x32xf32>
    %c0_74 = arith.constant 0 : index
    %c0_75 = arith.constant 0 : index
    %c0_76 = arith.constant 0 : index
    %181 = vector.load %arg19[%c0_74, %c0_75, %c0_76] : memref<1x8x32xf32, #tpu.memory_space<vmem>>, vector<1x8x32xf32>
    %182 = vector.shape_cast %181 : vector<1x8x32xf32> to vector<8x32xf32>
    %183 = vector.shape_cast %128 : vector<8x32xf32> to vector<1x8x32xf32>
    tpu.vector_store %arg19[%c0_74, %c0_75, %c0_76], %183 {strides = array<i32>} : memref<1x8x32xf32, #tpu.memory_space<vmem>>, vector<1x8x32xf32>,
    %c0_77 = arith.constant 0 : index
    %c0_78 = arith.constant 0 : index
    %c0_79 = arith.constant 0 : index
    %184 = vector.load %arg18[%c0_77, %c0_78, %c0_79] : memref<1x8x32xf32, #tpu.memory_space<vmem>>, vector<1x8x32xf32>
    %185 = vector.shape_cast %184 : vector<1x8x32xf32> to vector<8x32xf32>
    %186 = vector.shape_cast %180 : vector<8x32xf32> to vector<1x8x32xf32>
    tpu.vector_store %arg18[%c0_77, %c0_78, %c0_79], %186 {strides = array<i32>} : memref<1x8x32xf32, #tpu.memory_space<vmem>>, vector<1x8x32xf32>,
    return
  }
  func.func @transform_0(%arg0: i32) -> (i32, i32, i32) {
    %c0_i32 = arith.constant 0 : i32
    %c0_i32_0 = arith.constant 0 : i32
    %c0_i32_1 = arith.constant 0 : i32
    return %arg0, %c0_i32, %c0_i32_0 : i32, i32, i32
  }
  func.func @transform_1(%arg0: i32) -> (i32, i32, i32) {
    %c0_i32 = arith.constant 0 : i32
    %c0_i32_0 = arith.constant 0 : i32
    %c0_i32_1 = arith.constant 0 : i32
    return %arg0, %c0_i32, %c0_i32_0 : i32, i32, i32
  }
  func.func @transform_2(%arg0: i32) -> (i32, i32) {
    %c0_i32 = arith.constant 0 : i32
    %c0_i32_0 = arith.constant 0 : i32
    %c0_i32_1 = arith.constant 0 : i32
    return %c0_i32, %c0_i32_0 : i32, i32
  }
  func.func @transform_3(%arg0: i32) -> (i32, i32) {
    %c0_i32 = arith.constant 0 : i32
    %c0_i32_0 = arith.constant 0 : i32
    %c0_i32_1 = arith.constant 0 : i32
    return %c0_i32, %c0_i32_0 : i32, i32
  }
  func.func @transform_4(%arg0: i32) -> (i32, i32) {
    %c0_i32 = arith.constant 0 : i32
    %c0_i32_0 = arith.constant 0 : i32
    %c0_i32_1 = arith.constant 0 : i32
    return %c0_i32, %c0_i32_0 : i32, i32
  }
  func.func @transform_5(%arg0: i32) -> (i32, i32) {
    %c0_i32 = arith.constant 0 : i32
    %c0_i32_0 = arith.constant 0 : i32
    %c0_i32_1 = arith.constant 0 : i32
    return %c0_i32, %c0_i32_0 : i32, i32
  }
  func.func @transform_6(%arg0: i32) -> (i32, i32) {
    %c0_i32 = arith.constant 0 : i32
    %c0_i32_0 = arith.constant 0 : i32
    %c0_i32_1 = arith.constant 0 : i32
    return %c0_i32, %c0_i32_0 : i32, i32
  }
  func.func @transform_7(%arg0: i32) -> (i32, i32) {
    %c0_i32 = arith.constant 0 : i32
    %c0_i32_0 = arith.constant 0 : i32
    %c0_i32_1 = arith.constant 0 : i32
    return %c0_i32, %c0_i32_0 : i32, i32
  }
  func.func @transform_8(%arg0: i32) -> (i32, i32) {
    %c0_i32 = arith.constant 0 : i32
    %c0_i32_0 = arith.constant 0 : i32
    %c0_i32_1 = arith.constant 0 : i32
    return %c0_i32, %c0_i32_0 : i32, i32
  }
  func.func @transform_9(%arg0: i32) -> (i32, i32) {
    %c0_i32 = arith.constant 0 : i32
    %c0_i32_0 = arith.constant 0 : i32
    %c0_i32_1 = arith.constant 0 : i32
    return %c0_i32, %c0_i32_0 : i32, i32
  }
  func.func @transform_10(%arg0: i32) -> (i32, i32) {
    %c0_i32 = arith.constant 0 : i32
    %c0_i32_0 = arith.constant 0 : i32
    %c0_i32_1 = arith.constant 0 : i32
    return %c0_i32, %c0_i32_0 : i32, i32
  }
  func.func @transform_11(%arg0: i32) -> (i32, i32) {
    %c0_i32 = arith.constant 0 : i32
    %c0_i32_0 = arith.constant 0 : i32
    %c0_i32_1 = arith.constant 0 : i32
    return %c0_i32, %c0_i32_0 : i32, i32
  }
  func.func @transform_12(%arg0: i32) -> (i32, i32) {
    %c0_i32 = arith.constant 0 : i32
    %c0_i32_0 = arith.constant 0 : i32
    %c0_i32_1 = arith.constant 0 : i32
    return %c0_i32, %c0_i32_0 : i32, i32
  }
  func.func @transform_13(%arg0: i32) -> (i32, i32) {
    %c0_i32 = arith.constant 0 : i32
    %c0_i32_0 = arith.constant 0 : i32
    %c0_i32_1 = arith.constant 0 : i32
    return %c0_i32, %c0_i32_0 : i32, i32
  }
  func.func @transform_14(%arg0: i32) -> (i32, i32) {
    %c0_i32 = arith.constant 0 : i32
    %c0_i32_0 = arith.constant 0 : i32
    %c0_i32_1 = arith.constant 0 : i32
    return %c0_i32, %c0_i32_0 : i32, i32
  }
  func.func @transform_15(%arg0: i32) -> (i32, i32) {
    %c0_i32 = arith.constant 0 : i32
    %c0_i32_0 = arith.constant 0 : i32
    %c0_i32_1 = arith.constant 0 : i32
    return %c0_i32, %c0_i32_0 : i32, i32
  }
  func.func @transform_16(%arg0: i32) -> (i32, i32) {
    %c0_i32 = arith.constant 0 : i32
    %c0_i32_0 = arith.constant 0 : i32
    %c0_i32_1 = arith.constant 0 : i32
    return %c0_i32, %c0_i32_0 : i32, i32
  }
  func.func @transform_17(%arg0: i32) -> (i32, i32, i32) {
    %c0_i32 = arith.constant 0 : i32
    %c0_i32_0 = arith.constant 0 : i32
    %c0_i32_1 = arith.constant 0 : i32
    return %arg0, %c0_i32, %c0_i32_0 : i32, i32, i32
  }
  func.func @transform_18(%arg0: i32) -> (i32, i32, i32) {
    %c0_i32 = arith.constant 0 : i32
    %c0_i32_0 = arith.constant 0 : i32
    %c0_i32_1 = arith.constant 0 : i32
    return %arg0, %c0_i32, %c0_i32_0 : i32, i32, i32
  }
}

</mosaic_0001>

<bundles_post_ra>
// kernel: forward.3
= control target key start
LH: loop header
LB: loop body
LE: loop exit
PB: predicated region body
PF: predicated region fallthrough
CT: control target
= control target key end

     0   :  { %s1504_s3 = smov 0   ;;  %s1686_s0 = inlined_call_operand.vmem [shape: f32[2,1,8], index: 0, kind: input, shape index: {}]   ;;  %s1687_s1 = inlined_call_operand.vmem [shape: f32[2,8,32], index: 1, kind: input, shape index: {}]   ;;  %s1688_s2 = inlined_call_operand.vmem [shape: f32[8,32], index: 2, kind: input, shape index: {}]   ;;  %s1689_s3 = inlined_call_operand.vmem [shape: f32[1,32], index: 3, kind: input, shape index: {}]   ;;  %s1690_s4 = inlined_call_operand.vmem [shape: f32[1,32], index: 4, kind: input, shape index: {}]   ;;  %s1691_s5 = inlined_call_operand.vmem [shape: f32[32,96], index: 5, kind: input, shape index: {}]   ;;  %s1692_s6 = inlined_call_operand.vmem [shape: f32[1,96], index: 6, kind: input, shape index: {}]   ;;  %s1693_s7 = inlined_call_operand.vmem [shape: f32[32,32], index: 7, kind: input, shape index: {}]   ;;  %s1694_s8 = inlined_call_operand.vmem [shape: f32[1,32], index: 8, kind: input, shape index: {}]   ;;  %s1695_s9 = inlined_call_operand.vmem [shape: f32[1,32], index: 9, kind: input, shape index: {}]   ;;  %s1696_s10 = inlined_call_operand.vmem [shape: f32[1,32], index: 10, kind: input, shape index: {}]   ;;  %s1697_s11 = inlined_call_operand.vmem [shape: f32[32,64], index: 11, kind: input, shape index: {}]   ;;  %s1698_s12 = inlined_call_operand.vmem [shape: f32[1,64], index: 12, kind: input, shape index: {}]   ;;  %s1699_s13 = inlined_call_operand.vmem [shape: f32[64,32], index: 13, kind: input, shape index: {}]   ;;  %s1700_s14 = inlined_call_operand.vmem [shape: f32[1,32], index: 14, kind: input, shape index: {}]   ;;  %s1701_s15 = inlined_call_operand.vmem [shape: f32[1,32], index: 15, kind: input, shape index: {}]   ;;  %s1702_s16 = inlined_call_operand.vmem [shape: f32[1,32], index: 16, kind: input, shape index: {}]   ;;  %s1703_s17 = inlined_call_operand.vmem [shape: f32[2,8,32], index: 17, kind: output, shape index: {0}]   ;;  %s1704_s18 = inlined_call_operand.vmem [shape: f32[2,8,32], index: 18, kind: output, shape index: {1}]  }
   0x1   :  { %1705 = sst [smem:[#allocation3_spill]] %s1686_s0 }
   0x2   :  { %1706 = sst [smem:[#allocation4_spill]] %s1687_s1 }
   0x3   :  { %1707 = sst [smem:[#allocation5_spill]] %s1688_s2 }
   0x4 LB: > { %s1253_s25 = sadd.s32 4294967295, %s1399_s3   ;;  %p1257_p0 = scmp.ge.s32.totalorder %s1399_s3, 1  ;;  %s1399_s3 = sphi %s1504_s3, %s29_s3  }
   0x5   : > { %p522_p1 = scmp.lt.s32.totalorder %s1399_s3, 3 }
   0x7   : > { %p523_p2 = pnand %p1257_p0, %p522_p1 }
   0x8   : > { %v601_v0 = vld [vmem:[%s1691_s5] sm:$0xff] (!%p523_p2)  ;;  %v602_v1 = vld [vmem:[%s1691_s5 + $0x8] sm:$0xff] (!%p523_p2)  ;;  %v603_v2 = vld [vmem:[%s1691_s5 + $0x10] sm:$0xff] (!%p523_p2)  ;;  %p581_p3 = scmp.lt.s32.totalorder (!%p523_p2), %s1253_s25, 1  ;;  %v1401_v3 = vmov (!%p523_p2), 0.0   ;;  %vm1402_vm0 = vmmov (!%p523_p2), 0   ;;  %v659_v23 = vlaneseq (!%p523_p2) }
   0x9   : > { %526 = sbr.rel (%p523_p2) target bundleno = 2542 (0x9ee), region = 88  ;;  %1303 = vmatprep.subr.bf16.mxu0 (!%p523_p2), %v1401_v3  ;;  %v605_v4 = vpack.c.bf16 (!%p523_p2), %v602_v1, %v601_v0  ;;  %v604_v5 = vld [vmem:[%s1691_s5 + $0x18] sm:$0xff] (!%p523_p2)  ;;  %1307 = vmatprep.mubr.msk.bf16.mxu0 (!%p523_p2), %vm1402_vm0, %v1401_v3  ;;  %s1708_s21 = sld [smem:[#allocation5_spill]] (!%p523_p2)  ;;  %vm614_vm1 = vcmask (!%p523_p2), 261120   ;;  %v1261_v11 = vld [vmem:[%s1692_s6] ss:$0 sm:$0xff] (!%p523_p2) }
   0xa   : > { %1311 = vmatprep.subr.bf16.mxu1 (!%p523_p2), %v1401_v3  ;;  %1313 = vmatprep.mubr.msk.bf16.mxu1 (!%p523_p2), %vm1402_vm0, %v1401_v3  ;;  %v606_v6 = vpack.c.bf16 (!%p523_p2), %v604_v5, %v603_v2  ;;  %s1709_s24 = sld [smem:[#allocation4_spill]] (!%p523_p2)  ;;  %s1403_s28 = smov (!%p523_p2), 112   ;;  %vm679_vm2 = vcmask (!%p523_p2), 130048   ;;  %v660_v24 = vshrl.u32 (!%p523_p2), %v659_v23, 7  ;;  %v662_v25 = vand.u32 (!%p523_p2), 127, %v659_v23  ;;  %v912_v5 = vld [vmem:[%s1693_s7 + $0x8] sm:$0xff] (!%p523_p2) }
   0xb   : > { %1304 = vmatpush3.bf16.msra.mxu0 (!%p523_p2), %v605_v4  ;;  %s1404_s0 = smov (!%p523_p2), 96   ;;  %s1405_s29 = smov (!%p523_p2), 80   ;;  %vm728_vm4 = vcmask (!%p523_p2), 64512   ;;  %vm746_vm5 = vcmask (!%p523_p2), 1043456   ;;  %v911_v4 = vld [vmem:[%s1693_s7] sm:$0xff] (!%p523_p2)  ;;  %vm907_vm6 = vcmask (!%p523_p2), 261248  }
   0xc   : > { %1305 = vmatprep.subr.bf16.mxu0 (!%p523_p2), %v1401_v3  ;;  %s1710_s20 = sld [smem:[#allocation3_spill]] (!%p523_p2)  ;;  %vm663_vm3 = vcmp.le.s32.totalorder (!%p523_p2), %v662_v25, %v660_v24  ;;  %vm1084_vm7 = vcmask (!%p523_p2), 523264  }
   0xd   : > { %v1263_v27 = vsel (!%p523_p2), %vm663_vm3, 1.0, %v1401_v3 }
   0xf   : > { %v598_v7 = vld [vmem:[%s1708_s21] sm:$0xff] (!%p523_p2)  ;;  %1306 = vmatpush3.bf16.msra.mxu0 (!%p523_p2), %v606_v6  ;;  %s1407_s21 = smov (!%p523_p2), 48   ;;  %v913_v6 = vld [vmem:[%s1693_s7 + $0x10] sm:$0xff] (!%p523_p2) }
  0x10   : > { %s1712_s25 = smov (!%p581_p3, %s1253_s25), 1  ;;  %1317 = vmatprep.subr.bf16.mxu0 %v1401_v3 }
  0x11   : > { %s1534_s19 = sshll.u32 %s1712_s25, 3 }
  0x12   : > { %s587_s4 = scalar_lea.vmem %s1709_s24, %s1534_s19  ;;  %s583_s2 = scalar_lea.vmem %s1710_s20, %s1712_s25 }
  0x13   : > { %v1543_v8 = vld [vmem:[%s587_s4] sm:$0xff]  ;;  %s1406_s25 = smov 64   ;;  %s595_s30 = scalar_lea.vmem %s1704_s18, %s1534_s19 }
  0x14   : > { %v599_v9 = vadd.f32 %v598_v7, %v1543_v8  ;;  %v1264_v26 = vld [vmem:[%s583_s2] ss:$0 sm:$0xff]  ;;  %v915_v7 = vpack.c.bf16 %v912_v5, %v911_v4 }
  0x15   : > { %v672_v28 = vmul.f32 %v1264_v26, %v1263_v27 }
  0x16   : > { %v600_v10 = vpack.c.bf16 %v599_v9, %v599_v9  ;;  %v914_v9 = vld [vmem:[%s1693_s7 + $0x18] sm:$0xff] }
  0x17   : > { %v673_v29 = vsub.f32 1.0, %v672_v28 }
  0x18   : > { %1308 = vmatmul.mubr.msk.bf16.vlgmr.msra.gmra.mrb[0].mxu0 %vm614_vm1, %v600_v10  ;;  %v916_v10 = vpack.c.bf16 %v914_v9, %v913_v6 }
  0x19   : > { %1319 = vmatprep.mubr.msk.bf16.mxu0 %vm1402_vm0, %v1401_v3  ;;  %v674_v30 = vmul.f32 -10000.0, %v673_v29 }
  0xeb   : > { %v652_v12 = vpop.f32.mrb[0].mxu0 }
  0xec   : > { %v653_v13 = vadd.f32 %v1261_v11, %v652_v12  ;;  %v1309_v14 = vpop.f32.mrb[1].mxu0 }
  0xed   : > { %v655_v15 = vpop.f32.mrb[2].mxu0 }
  0xee   : > { %v1553_v16 = vpack.c.bf16 %v653_v13, %v653_v13  ;;  %v1310_v17 = vpop.f32.mrb[3].mxu0 }
  0xf0   : > { %791 = vrot.lane.b32.xlu1 %v1553_v16, %s1403_s28  ;;  %677 = vrot.lane.b32.xlu0 %v1553_v16, %s1404_s0  ;;  %s591_s0 = scalar_lea.vmem %s1703_s17, %s1534_s19 }
  0xf4   : > { %793 = vrot.lane.b32.xlu0 %v1553_v16, %s1405_s29  ;;  %s1408_s29 = smov 16  }
 0x162   : > { %v678_v18 = vpop.permute.xlu0 %677  ;;  %v792_v22 = vpop.permute.xlu1 %791 }
 0x163   : > { %v684_v19 = vsel %vm679_vm2, %v678_v18, 0 }
 0x164   : > { %1312 = vmatpush3.bf16.xpose.msra.mxu1 %v684_v19 }
 0x165   : > { %1323 = vmatprep.subr.bf16.mxu1 %v1401_v3 }
 0x166   : > { %v794_v20 = vpop.permute.xlu0 %793 }
 0x167   : > { %v799_v21 = vsel %vm679_vm2, %v794_v20, 0 }
 0x16b   : > { %1314 = vmatmul.mubr.msk.bf16.vlgmr.msra.gmra.mrb[0].mxu1 %vm679_vm2, %v1553_v16 }
 0x16c   : > { %1324 = vmatpush3.bf16.xpose.msra.mxu1 %v799_v21  ;;  %1325 = vmatprep.mubr.msk.bf16.mxu1 %vm1402_vm0, %v1401_v3 }
 0x16d   : > { %1335 = vmatprep.subr.bf16.mxu1 %v1401_v3 }
 0x173   : > { %1326 = vmatmul.mubr.msk.bf16.vlgmr.msra.gmra.mrb[4].mxu1 %vm679_vm2, %v792_v22  ;;  %v1269_v22 = vld [vmem:[%s1694_s8] ss:$0 sm:$0xff] }
 0x174   : > { %1339 = vmatprep.mubr.msk.bf16.mxu1 %vm1402_vm0, %v1401_v3  ;;  %1336 = vmatpush3.bf16.msra.mxu1 %v915_v7 }
 0x175   : > { %1337 = vmatprep.subr.bf16.mxu1 %v1401_v3 }
 0x178   : > { %1338 = vmatpush3.bf16.msra.mxu1 %v916_v10 }
 0x179   : > { %1351 = vmatprep.subr.bf16.mxu1 %v1401_v3 }
 0x23e   : > { %v720_v31 = vpop.f32.mrb[0].mxu1 }
 0x23f   : > { %v726_v32 = vmul.f32 0.25, %v720_v31  ;;  %v1315_v33 = vpop.f32.mrb[1].mxu1 }
 0x240   : > { %v723_v34 = vpop.f32.mrb[2].mxu1 }
 0x241   : > { %v1316_v35 = vpop.f32.mrb[3].mxu1  ;;  %v727_v36 = vadd.f32 %v726_v32, %v674_v30 }
 0x242   : > { %v999_v35 = vld [vmem:[%s1697_s11] sm:$0xff] }
 0x243   : > { %v729_v37 = vsel %vm728_vm4, %v727_v36, -inf }
 0x244   : > { %730 = vmax.xlane.f32.xlu1 %v729_v37 }
 0x246   : > { %v835_v38 = vpop.f32.mrb[4].mxu1 }
 0x247   : > { %v841_v39 = vmul.f32 0.25, %v835_v38  ;;  %v1327_v40 = vpop.f32.mrb[5].mxu1  ;;  %v1002_v38 = vld [vmem:[%s1697_s11 + $0x18] sm:$0xff] }
 0x248   : > { %v838_v41 = vpop.f32.mrb[6].mxu1 }
 0x249   : > { %v1328_v42 = vpop.f32.mrb[7].mxu1  ;;  %v842_v43 = vadd.f32 %v841_v39, %v674_v30 }
 0x24b   : > { %v843_v44 = vsel %vm728_vm4, %v842_v43, -inf }
 0x24c   : > { %844 = vmax.xlane.f32.xlu0 %v843_v44  ;;  %v1271_v44 = vld [vmem:[%s1695_s9] ss:$0 sm:$0xff] }
 0x2d1   : > { %v731_v45 = vpop.xlane.xlu1 %730 }
 0x2d2   : > { %v732_v46 = vsub.f32 %v727_v36, %v731_v45  ;;  %v1000_v36 = vld [vmem:[%s1697_s11 + $0x8] sm:$0xff] }
 0x2d3   : > { %v1003_v37 = vpack.c.bf16 %v1000_v36, %v999_v35 }
 0x2d4   : > { %v733_v47 = vmul.f32 1.442695, %v732_v46  ;;  %v1272_v46 = vld [vmem:[%s1696_s10] ss:$0 sm:$0xff] }
 0x2d6   : > { %1379 = vpow2.f32 %v733_v47 }
 0x2d9   : > { %v845_v48 = vpop.xlane.xlu0 %844 }
 0x2da   : > { %v846_v49 = vsub.f32 %v842_v43, %v845_v48 }
 0x2dc   : > { %v847_v50 = vmul.f32 1.442695, %v846_v49 }
 0x2de   : > { %1381 = vpow2.f32 %v847_v50  ;;  %v1065_v50 = vld [vmem:[%s1699_s13] sm:$0xff] }
 0x2e0   : > { %v1380_v51 = vpop.eup %1379 }
 0x2e1   : > { %v735_v52 = vsel %vm728_vm4, %v1380_v51, 0.0 }
 0x2e2   : > { %736 = vadd.xlane.f32.xlu0 %v735_v52  ;;  %v1067_v52 = vld [vmem:[%s1699_s13 + $0x10] sm:$0xff] }
 0x2e8   : > { %v1382_v53 = vpop.eup %1381 }
 0x2e9   : > { %v849_v54 = vsel %vm728_vm4, %v1382_v53, 0.0 }
 0x2ea   : > { %850 = vadd.xlane.f32.xlu1 %v849_v54  ;;  %v1068_v54 = vld [vmem:[%s1699_s13 + $0x18] sm:$0xff] }
 0x2f8   : > { %741 = vrot.lane.b32.xlu0 %v1553_v16, %s1406_s25 }
 0x2fb   : > { %855 = vrot.lane.b32.xlu1 %v1553_v16, %s1407_s21 }
 0x36f   : > { %v737_v55 = vpop.xlane.xlu0 %736 }
 0x370   : > { %1383 = vrcp.f32 %v737_v55  ;;  %v1074_v55 = vpack.c.bf16 %v1068_v54, %v1067_v52 }
 0x373   : > { %v742_v56 = vpop.permute.xlu0 %741 }
 0x374   : > { %v748_v57 = vsel %vm746_vm5, %v742_v56, 0  ;;  %v1069_v56 = vld [vmem:[%s1699_s13 + $0x20] sm:$0xff] }
 0x375   : > { %1318 = vmatpush3.bf16.msra.mxu0 %v748_v57  ;;  %v1070_v57 = vld [vmem:[%s1699_s13 + $0x28] sm:$0xff] }
 0x376   : > { %1329 = vmatprep.subr.bf16.mxu0 %v1401_v3 }
 0x377   : > { %v851_v58 = vpop.xlane.xlu1 %850 }
 0x378   : > { %1385 = vrcp.f32 %v851_v58  ;;  %v1075_v58 = vpack.c.bf16 %v1070_v57, %v1069_v56 }
 0x37a   : > { %v1384_v59 = vpop.eup %1383 }
 0x37b   : > { %v739_v60 = vmul.f32 %v1384_v59, %v1380_v51  ;;  %v856_v61 = vpop.permute.xlu1 %855  ;;  %v1066_v51 = vld [vmem:[%s1699_s13 + $0x8] sm:$0xff]  ;;  %v1071_v59 = vld [vmem:[%s1699_s13 + $0x30] sm:$0xff] }
 0x37c   : > { %v861_v63 = vsel %vm746_vm5, %v856_v61, 0 }
 0x37d   : > { %v740_v62 = vpack.c.bf16 %v739_v60, %v739_v60  ;;  %v1072_v60 = vld [vmem:[%s1699_s13 + $0x38] sm:$0xff] }
 0x37e   : > { %v1076_v61 = vpack.c.bf16 %v1072_v60, %v1071_v59 }
 0x37f   : > { %1320 = vmatmul.mubr.msk.bf16.vlgmr.msra.gmra.mrb[4].mxu0 %vm728_vm4, %v740_v62  ;;  %v1273_v62 = vld [vmem:[%s1698_s12] ss:$0 sm:$0xff] }
 0x380   : > { %1330 = vmatpush3.bf16.msra.mxu0 %v861_v63  ;;  %1331 = vmatprep.mubr.msk.bf16.mxu0 %vm1402_vm0, %v1401_v3 }
 0x381   : > { %1343 = vmatprep.subr.bf16.mxu0 %v1401_v3 }
 0x382   : > { %v1386_v0 = vpop.eup %1385 }
 0x383   : > { %v853_v1 = vmul.f32 %v1386_v0, %v1382_v53  ;;  %v1073_v53 = vpack.c.bf16 %v1066_v51, %v1065_v50 }
 0x385   : > { %v854_v2 = vpack.c.bf16 %v853_v1, %v853_v1 }
 0x387   : > { %1332 = vmatmul.mubr.msk.bf16.vlgmr.msra.gmra.mrb[8].mxu0 %vm728_vm4, %v854_v2 }
 0x388   : > { %1347 = vmatprep.mubr.msk.bf16.mxu0 %vm1402_vm0, %v1401_v3  ;;  %1344 = vmatpush3.bf16.msra.mxu0 %v1003_v37 }
 0x389   : > { %1345 = vmatprep.subr.bf16.mxu0 %v1401_v3 }
 0x452   : > { %v784_v11 = vpop.f32.mrb[4].mxu0 }
 0x453   : > { %790 = vst.msk [vmem:[#allocation2] sm:$0xff] %vm679_vm2, %v784_v11  ;;  %v1321_v12 = vpop.f32.mrb[5].mxu0 }
 0x454   : > { %v787_v13 = vpop.f32.mrb[6].mxu0 }
 0x455   : > { %v1322_v14 = vpop.f32.mrb[7].mxu0 }
 0x45a   : > { %v897_v15 = vpop.f32.mrb[8].mxu0 }
 0x45b   : > { %904 = vrot.lane.b32.xlu1 %v897_v15, %s1408_s29  ;;  %v1333_v16 = vpop.f32.mrb[9].mxu0  ;;  %v1275_v15 = vld [vmem:[%s1700_s14] ss:$0 sm:$0xff] }
 0x45c   : > { %v900_v17 = vpop.f32.mrb[10].mxu0 }
 0x45d   : > { %v1334_v18 = vpop.f32.mrb[11].mxu0 }
 0x4cd   : > { %v905_v19 = vpop.permute.xlu1 %904 }
 0x4ce   : > { %908 = vst.msk [vmem:[#allocation2] sm:$0xff] %vm907_vm6, %v905_v19 }
 0x4d5   : > { %v909_v20 = vld [vmem:[#allocation2] sm:$0xff] }
 0x4d6   : > { %v910_v21 = vpack.c.bf16 %v909_v20, %v909_v20 }
 0x4d8   : > { %1340 = vmatmul.mubr.msk.bf16.vlgmr.msra.gmra.mrb[8].mxu1 %vm614_vm1, %v910_v21 }
 0x4d9   : > { %1359 = vmatprep.mubr.msk.bf16.mxu1 %vm1402_vm0, %v1401_v3  ;;  %1352 = vmatpush3.bf16.msra.mxu1 %v1073_v53 }
 0x4da   : > { %1353 = vmatprep.subr.bf16.mxu1 %v1401_v3 }
 0x4dd   : > { %1354 = vmatpush3.bf16.msra.mxu1 %v1074_v55 }
 0x4de   : > { %1355 = vmatprep.subr.bf16.mxu1 %v1401_v3 }
 0x4e1   : > { %1356 = vmatpush3.bf16.msra.mxu1 %v1075_v58 }
 0x4e2   : > { %1357 = vmatprep.subr.bf16.mxu1 %v1401_v3 }
 0x4e5   : > { %1358 = vmatpush3.bf16.msra.mxu1 %v1076_v61 }
 0x5ab   : > { %v961_v23 = vpop.f32.mrb[8].mxu1 }
 0x5ac   : > { %v962_v24 = vadd.f32 %v1269_v22, %v961_v23  ;;  %v1341_v25 = vpop.f32.mrb[9].mxu1 }
 0x5ad   : > { %v964_v26 = vpop.f32.mrb[10].mxu1 }
 0x5ae   : > { %v1342_v27 = vpop.f32.mrb[11].mxu1  ;;  %v967_v28 = vadd.f32 %v962_v24, %v1543_v8  ;;  %v1001_v8 = vld [vmem:[%s1697_s11 + $0x10] sm:$0xff] }
 0x5af   : > { %v1004_v39 = vpack.c.bf16 %v1002_v38, %v1001_v8 }
 0x5b0   : > { %v968_v29 = vsel %vm614_vm1, %v967_v28, 0.0 }
 0x5b1   : > { %969 = vadd.xlane.f32.xlu0 %v968_v29  ;;  %1346 = vmatpush3.bf16.msra.mxu0 %v1004_v39 }
 0x63e   : > { %v970_v30 = vpop.xlane.xlu0 %969 }
 0x63f   : > { %v972_v31 = vmul.f32 0.03125, %v970_v30 }
 0x641   : > { %v973_v32 = vsub.f32 %v967_v28, %v972_v31 }
 0x643   : > { %v974_v33 = vmul.f32 %v973_v32, %v973_v32 }
 0x645   : > { %v975_v34 = vsel %vm614_vm1, %v974_v33, 0.0 }
 0x646   : > { %976 = vadd.xlane.f32.xlu1 %v975_v34  ;;  %v1278_v34 = vld [vmem:[%s1702_s16] ss:$0 sm:$0xff] }
 0x6d3   : > { %v977_v40 = vpop.xlane.xlu1 %976 }
 0x6d4   : > { %v978_v41 = vmul.f32 0.03125, %v977_v40 }
 0x6d6   : > { %v979_v42 = vadd.f32 1e-12, %v978_v41 }
 0x6d8   : > { %1387 = vrsqrt.f32 %v979_v42 }
 0x6e2   : > { %v1388_v43 = vpop.eup %1387 }
 0x6e3   : > { %v981_v45 = vmul.f32 %v1388_v43, %v973_v32  ;;  %v1277_v32 = vld [vmem:[%s1701_s15] ss:$0 sm:$0xff] }
 0x6e5   : > { %v989_v47 = vmul.f32 %v1271_v44, %v981_v45 }
 0x6e7   : > { %v997_v48 = vadd.f32 %v1272_v46, %v989_v47 }
 0x6e9   : > { %1158 = vst.msk [vmem:[%s595_s30] sm:$0xff] %vm614_vm1, %v997_v48  ;;  %v998_v49 = vpack.c.bf16 %v997_v48, %v997_v48 }
 0x6eb   : > { %1348 = vmatmul.mubr.msk.bf16.vlgmr.msra.gmra.mrb[12].mxu0 %vm614_vm1, %v998_v49 }
 0x7be   : > { %v1049_v63 = vpop.f32.mrb[12].mxu0 }
 0x7bf   : > { %v1050_v0 = vadd.f32 %v1273_v62, %v1049_v63  ;;  %v1349_v1 = vpop.f32.mrb[13].mxu0 }
 0x7c0   : > { %v1052_v2 = vpop.f32.mrb[14].mxu0 }
 0x7c1   : > { %v1056_v4 = vmul.f32 0.044715, %v1050_v0  ;;  %v1350_v5 = vpop.f32.mrb[15].mxu0  ;;  %v1055_v12 = vmul.f32 0.5, %v1050_v0 }
 0x7c3   : > { %v1057_v6 = vmul.f32 %v1056_v4, %v1050_v0 }
 0x7c5   : > { %v1058_v7 = vmul.f32 %v1057_v6, %v1050_v0 }
 0x7c7   : > { %v1059_v9 = vadd.f32 %v1058_v7, %v1050_v0 }
 0x7c9   : > { %v1060_v10 = vmul.f32 0.7978846, %v1059_v9 }
 0x7cb   : > { %1389 = vtanh.f32 %v1060_v10 }
 0x7d5   : > { %v1390_v11 = vpop.eup %1389 }
 0x7d6   : > { %v1062_v13 = vadd.f32 1.0, %v1390_v11 }
 0x7d8   : > { %v1063_v3 = vmul.f32 %v1062_v13, %v1055_v12 }
 0x7da   : > { %v1064_v14 = vpack.c.bf16 %v1063_v3, %v1063_v3 }
 0x7dc   : > { %1360 = vmatmul.mubr.msk.bf16.vlgmr.msra.gmra.mrb[12].mxu1 %vm1084_vm7, %v1064_v14 }
 0x8af   : > { %v1122_v16 = vpop.f32.mrb[12].mxu1 }
 0x8b0   : > { %v1123_v17 = vadd.f32 %v1275_v15, %v1122_v16  ;;  %v1361_v18 = vpop.f32.mrb[13].mxu1 }
 0x8b1   : > { %v1125_v19 = vpop.f32.mrb[14].mxu1 }
 0x8b2   : > { %v1362_v20 = vpop.f32.mrb[15].mxu1  ;;  %v1128_v21 = vadd.f32 %v1123_v17, %v997_v48 }
 0x8b4   : > { %v1129_v22 = vsel %vm614_vm1, %v1128_v21, 0.0 }
 0x8b5   : > { %1130 = vadd.xlane.f32.xlu0 %v1129_v22 }
 0x942   : > { %v1131_v23 = vpop.xlane.xlu0 %1130 }
 0x943   : > { %v1132_v24 = vmul.f32 0.03125, %v1131_v23 }
 0x945   : > { %v1133_v25 = vsub.f32 %v1128_v21, %v1132_v24 }
 0x947   : > { %v1134_v26 = vmul.f32 %v1133_v25, %v1133_v25 }
 0x949   : > { %v1135_v27 = vsel %vm614_vm1, %v1134_v26, 0.0 }
 0x94a   : > { %1136 = vadd.xlane.f32.xlu0 %v1135_v27 }
 0x9d7   : > { %v1137_v28 = vpop.xlane.xlu0 %1136 }
 0x9d8   : > { %v1138_v29 = vmul.f32 0.03125, %v1137_v28 }
 0x9da   : > { %v1139_v30 = vadd.f32 1e-12, %v1138_v29 }
 0x9dc   : > { %1391 = vrsqrt.f32 %v1139_v30 }
 0x9e6   : > { %v1392_v31 = vpop.eup %1391 }
 0x9e7   : > { %v1141_v33 = vmul.f32 %v1392_v31, %v1133_v25 }
 0x9e9   : > { %v1149_v35 = vmul.f32 %v1277_v32, %v1141_v33 }
 0x9eb   : > { %v1157_v36 = vadd.f32 %v1278_v34, %v1149_v35 }
 0x9ed   : > { %1159 = vst.msk [vmem:[%s591_s0] sm:$0xff] %vm614_vm1, %v1157_v36 }
 0x9ee PF: > { %s29_s3 = sadd.s32 1, %s1399_s3  }
 0x9ef   : > { %p26_p4 = scmp.ge.s32.totalorder %s29_s3, 4  }
 0x9f1   :  { %28 = sbr.rel (!%p26_p4) target bundleno = 4 (0x4), region = 133 }

// kernel: forward.2
= control target key start
LH: loop header
LB: loop body
LE: loop exit
PB: predicated region body
PF: predicated region fallthrough
CT: control target
= control target key end

     0   :  { %s1923_s0 = inlined_call_operand.vmem [shape: f32[2,1,8], index: 0, kind: input, shape index: {}]   ;;  %s1924_s1 = inlined_call_operand.vmem [shape: f32[2,8,32], index: 1, kind: input, shape index: {}]   ;;  %s1925_s2 = inlined_call_operand.vmem [shape: f32[8,32], index: 2, kind: input, shape index: {}]   ;;  %s1926_s3 = inlined_call_operand.vmem [shape: f32[1,32], index: 3, kind: input, shape index: {}]   ;;  %s1927_s4 = inlined_call_operand.vmem [shape: f32[1,32], index: 4, kind: input, shape index: {}]   ;;  %s1928_s5 = inlined_call_operand.vmem [shape: f32[32,96], index: 5, kind: input, shape index: {}]   ;;  %s1929_s6 = inlined_call_operand.vmem [shape: f32[1,96], index: 6, kind: input, shape index: {}]   ;;  %s1930_s7 = inlined_call_operand.vmem [shape: f32[32,32], index: 7, kind: input, shape index: {}]   ;;  %s1931_s8 = inlined_call_operand.vmem [shape: f32[1,32], index: 8, kind: input, shape index: {}]   ;;  %s1932_s9 = inlined_call_operand.vmem [shape: f32[1,32], index: 9, kind: input, shape index: {}]   ;;  %s1933_s10 = inlined_call_operand.vmem [shape: f32[1,32], index: 10, kind: input, shape index: {}]   ;;  %s1934_s11 = inlined_call_operand.vmem [shape: f32[32,64], index: 11, kind: input, shape index: {}]   ;;  %s1935_s12 = inlined_call_operand.vmem [shape: f32[1,64], index: 12, kind: input, shape index: {}]   ;;  %s1936_s13 = inlined_call_operand.vmem [shape: f32[64,32], index: 13, kind: input, shape index: {}]   ;;  %s1937_s14 = inlined_call_operand.vmem [shape: f32[1,32], index: 14, kind: input, shape index: {}]   ;;  %s1938_s15 = inlined_call_operand.vmem [shape: f32[1,32], index: 15, kind: input, shape index: {}]   ;;  %s1939_s16 = inlined_call_operand.vmem [shape: f32[1,32], index: 16, kind: input, shape index: {}]   ;;  %s1940_s17 = inlined_call_operand.vmem [shape: f32[2,8,32], index: 17, kind: output, shape index: {0}]   ;;  %s1941_s18 = inlined_call_operand.hbm [shape: f32[2,8,32], index: 18, kind: output, shape index: {1}]  }
   0x1   :  { %1949 = sst [smem:[#allocation10_spill]] %s1923_s0 }
   0x2   :  { %1950 = sst [smem:[#allocation11_spill]] %s1924_s1 }
   0x3   :  { %1951 = sst [smem:[#allocation12_spill]] %s1925_s2 }
   0x4   :  { %1952 = sst [smem:[#allocation13_spill]] %s1926_s3 }
   0x5   :  { %1953 = sst [smem:[#allocation14_spill]] %s1927_s4 }
   0x6   :  { %1954 = sst [smem:[#allocation15_spill]] %s1928_s5 }
   0x7   :  { %1955 = sst [smem:[#allocation16_spill]] %s1929_s6 }
   0x8   :  { %24 = vsyncpa [#allocation4], 0 }
   0x9   :  { %26 = vsyncpa [#allocation4 + $0x1], 0  ;;  %s1646_s27 = smov 0   ;;  %s1648_s28 = smov 0  }
   0xa   :  { %s1650_s29 = smov 0   ;;  %s1652_s30 = smov 0  }
   0xb LB: > { %1956 = sst [smem:[#allocation6_spill]] %s1536_s29  ;;  %s1667_s0 = sadd.s32 4294967295, %s1540_s30   ;;  %s1540_s30 = sphi %s1652_s30, %s1973_s30   ;;  %s1536_s29 = sphi %s1650_s29, %s1975_s29   ;;  %s1532_s28 = sphi %s1648_s28, %s1977_s28   ;;  %s1528_s27 = sphi %s1646_s27, %s1976_s27  }
   0xc   : > { %s1302_s19 = sadd.s32 4294967294, %s1540_s30   ;;  %s1671_s1 = sadd.s32 1, %s1540_s30  }
   0xd   : > { %1957 = sst [smem:[#allocation7_spill]] %s1671_s1  ;;  %s432_s20 = sadd.s32 1, %s1536_s29 }
   0xe   : > { %s429_s21 = ssub.s32 %s1540_s30, %s1671_s1  ;;  %p442_p0 = scmp.ne.s32.totalorder %s1536_s29, %s1532_s28 }
   0xf   : > { %p430_p1 = scmp.eq.s32.totalorder %s429_s21, 0  ;;  %p443_p2 = scmp.eq.s32.totalorder %s1667_s0, 1 }
  0x10   : > { %p448_p3 = scmp.ne.s32.totalorder %s1532_s28, %s1528_s27  ;;  %p449_p4 = scmp.eq.s32.totalorder %s1302_s19, 1 }
  0x11   : > { %s1682_s22 = scalar_select %p430_p1, %s1536_s29, %s432_s20  }
  0x12   : > { %p1684_p5 = por %p443_p2, %p442_p0  ;;  %p1688_p6 = por %p449_p4, %p448_p3 }
  0x13   : > { %1958 = sst [smem:[#allocation8_spill]] %s1682_s22  ;;  %p1305_p7 = scmp.ge.s32.totalorder %s1540_s30, 1 }
  0x14   : > { %s1960_s23 = scalar_select %p1688_p6, 1, 0 }
  0x15   : > { %p525_p8 = scmp.lt.s32.totalorder %s1540_s30, 3 }
  0x16   : > { %1961 = sst [smem:[#allocation9_spill]] %s1960_s23 }
  0x17   : > { %p526_p9 = pnand %p1305_p7, %p525_p8 }
  0x18   : > { %p585_p10 = scmp.lt.s32.totalorder (!%p526_p9), %s1667_s0, 1  ;;  %vm598_vm0 = vcmask (!%p526_p9), 261120   ;;  %s1962_s20 = sld [smem:[#allocation11_spill]] (!%p526_p9)  ;;  %v1542_v10 = vmov (!%p526_p9), 0.0   ;;  %vm1543_vm1 = vmmov (!%p526_p9), 0   ;;  %vm709_vm2 = vcmask (!%p526_p9), 130048  }
  0x19   : > { %529 = sbr.rel (%p526_p9) target bundleno = 2873 (0xb39), region = 88  ;;  %s1963_s5 = sld [smem:[#allocation15_spill]] (!%p526_p9)  ;;  %1355 = vmatprep.subr.bf16.mxu0 (!%p526_p9), %v1542_v10  ;;  %1359 = vmatprep.mubr.msk.bf16.mxu0 (!%p526_p9), %vm1543_vm1, %v1542_v10  ;;  %v689_v38 = vlaneseq (!%p526_p9)  ;;  %vm758_vm4 = vcmask (!%p526_p9), 64512   ;;  %vm776_vm5 = vcmask (!%p526_p9), 1043456   ;;  %vm937_vm6 = vcmask (!%p526_p9), 261248  }
  0x1a   : > { %1363 = vmatprep.subr.bf16.mxu1 (!%p526_p9), %v1542_v10  ;;  %1365 = vmatprep.mubr.msk.bf16.mxu1 (!%p526_p9), %vm1543_vm1, %v1542_v10  ;;  %s1964_s3 = sld [smem:[#allocation13_spill]] (!%p526_p9)  ;;  %s1965_s4 = sld [smem:[#allocation14_spill]] (!%p526_p9)  ;;  %vm1113_vm7 = vcmask (!%p526_p9), 523264  }
  0x1b   : > { %s1967_s6 = sld [smem:[#allocation16_spill]] (!%p526_p9)  ;;  %s1544_s1 = smov (!%p526_p9), 112   ;;  %v690_v39 = vshrl.u32 (!%p526_p9), %v689_v38, 7  ;;  %v692_v40 = vand.u32 (!%p526_p9), 127, %v689_v38 }
  0x1c   : > { %s1545_s22 = smov (!%p526_p9), 96   ;;  %s1546_s23 = smov (!%p526_p9), 80  }
  0x1d   : > { %vm693_vm3 = vcmp.le.s32.totalorder (!%p526_p9), %v692_v40, %v690_v39  ;;  %s1547_s29 = smov (!%p526_p9), 48   ;;  %s1947_s19 = sand.u32 (!%p526_p9), 1, %s1532_s28  }
  0x1e   : > { %v1313_v42 = vsel (!%p526_p9), %vm693_vm3, 1.0, %v1542_v10 }
  0x1f   : > { %v632_v7 = vld [vmem:[%s1963_s5] sm:$0xff] (!%p526_p9)  ;;  %v633_v8 = vld [vmem:[%s1963_s5 + $0x8] sm:$0xff] (!%p526_p9)  ;;  %v634_v9 = vld [vmem:[%s1963_s5 + $0x10] sm:$0xff] (!%p526_p9) }
  0x20   : > { %s1696_s24 = scalar_select %p585_p10, %s1667_s0, 1  ;;  %v636_v11 = vpack.c.bf16 %v633_v8, %v632_v7  ;;  %v635_v12 = vld [vmem:[%s1963_s5 + $0x18] sm:$0xff]  ;;  %v1309_v18 = vld [vmem:[%s1964_s3] ss:$0 sm:$0xff] }
  0x21   : > { %v637_v13 = vpack.c.bf16 %v635_v12, %v634_v9  ;;  %v1310_v20 = vld [vmem:[%s1965_s4] ss:$0 sm:$0xff]  ;;  %s1550_s4 = smov [#allocation3]  }
  0x22   : > { %s1946_s25 = sshll.u32 %s1696_s24, 3  ;;  %1356 = vmatpush3.bf16.msra.mxu0 %v636_v11  ;;  %v1311_v26 = vld [vmem:[%s1967_s6] ss:$0 sm:$0xff]  ;;  %s1482_s5 = sshll.u32 %s1550_s4, 4  ;;  %s1483_s5 = int_to_ptr.vmem [resolvable:$false] %s1482_s5 }
  0x23   : > { %s591_s21 = scalar_lea.vmem %s1962_s20, %s1946_s25  ;;  %1357 = vmatprep.subr.bf16.mxu0 %v1542_v10  ;;  %s1966_s20 = sld [smem:[#allocation12_spill]] }
  0x24   : > { %v597_v0 = vld [vmem:[%s591_s21] sm:$0xff]  ;;  %s1330_s25 = sshll.u32 %s1667_s0, 7  ;;  %s1484_s6 = scalar_lea.vmem %s1483_s5, 256 }
  0x25   : > { %v599_v1 = vsel %vm598_vm0, %v597_v0, 0.0 }
  0x26   : > { %600 = vadd.xlane.f32.xlu0 %v599_v1  ;;  %1358 = vmatpush3.bf16.msra.mxu0 %v637_v13 }
  0x27   : > { %1369 = vmatprep.subr.bf16.mxu0 %v1542_v10 }
  0x29   : > { %v629_v22 = vld [vmem:[%s1966_s20] sm:$0xff]  ;;  %s1968_s20 = sld [smem:[#allocation10_spill]] }
  0x2f   : > { %s587_s21 = scalar_lea.vmem %s1968_s20, %s1696_s24 }
  0x30   : > { %v1314_v41 = vld [vmem:[%s587_s21] ss:$0 sm:$0xff] }
  0x31   : > { %v702_v43 = vmul.f32 %v1314_v41, %v1313_v42 }
  0x33   : > { %v703_v44 = vsub.f32 1.0, %v702_v43 }
  0x35   : > { %v704_v45 = vmul.f32 -10000.0, %v703_v44 }
  0xb3   : > { %v601_v2 = vpop.xlane.xlu0 %600 }
  0xb4   : > { %v603_v3 = vmul.f32 0.03125, %v601_v2 }
  0xb6   : > { %v604_v4 = vsub.f32 %v597_v0, %v603_v3 }
  0xb8   : > { %v605_v5 = vmul.f32 %v604_v4, %v604_v4 }
  0xba   : > { %v606_v6 = vsel %vm598_vm0, %v605_v5, 0.0 }
  0xbb   : > { %607 = vadd.xlane.f32.xlu0 %v606_v6 }
 0x148   : > { %v608_v14 = vpop.xlane.xlu0 %607 }
 0x149   : > { %v609_v15 = vmul.f32 0.03125, %v608_v14 }
 0x14b   : > { %v610_v16 = vadd.f32 1e-12, %v609_v15 }
 0x14d   : > { %1462 = vrsqrt.f32 %v610_v16 }
 0x157   : > { %v1463_v17 = vpop.eup %1462 }
 0x158   : > { %v612_v19 = vmul.f32 %v1463_v17, %v604_v4 }
 0x15a   : > { %v620_v21 = vmul.f32 %v1309_v18, %v612_v19  ;;  %v941_v19 = vld [vmem:[%s1930_s7] sm:$0xff] }
 0x15c   : > { %v1735_v23 = vadd.f32 %v1310_v20, %v620_v21  ;;  %v942_v20 = vld [vmem:[%s1930_s7 + $0x8] sm:$0xff]  ;;  %v943_v21 = vld [vmem:[%s1930_s7 + $0x10] sm:$0xff] }
 0x15e   : > { %v630_v24 = vadd.f32 %v629_v22, %v1735_v23  ;;  %v945_v22 = vpack.c.bf16 %v942_v20, %v941_v19 }
 0x160   : > { %v631_v25 = vpack.c.bf16 %v630_v24, %v630_v24  ;;  %v944_v24 = vld [vmem:[%s1930_s7 + $0x18] sm:$0xff] }
 0x162   : > { %1360 = vmatmul.mubr.msk.bf16.vlgmr.msra.gmra.mrb[0].mxu0 %vm598_vm0, %v631_v25  ;;  %v946_v25 = vpack.c.bf16 %v944_v24, %v943_v21 }
 0x163   : > { %1371 = vmatprep.mubr.msk.bf16.mxu0 %vm1543_vm1, %v1542_v10 }
 0x235   : > { %v682_v27 = vpop.f32.mrb[0].mxu0 }
 0x236   : > { %v683_v28 = vadd.f32 %v1311_v26, %v682_v27  ;;  %v1361_v29 = vpop.f32.mrb[1].mxu0 }
 0x237   : > { %v685_v30 = vpop.f32.mrb[2].mxu0 }
 0x238   : > { %v1744_v31 = vpack.c.bf16 %v683_v28, %v683_v28  ;;  %v1362_v32 = vpop.f32.mrb[3].mxu0 }
 0x23a   : > { %821 = vrot.lane.b32.xlu0 %v1744_v31, %s1544_s1  ;;  %707 = vrot.lane.b32.xlu1 %v1744_v31, %s1545_s22  ;;  %s1548_s1 = smov 64   ;;  %s1549_s22 = smov 16  }
 0x23e   : > { %823 = vrot.lane.b32.xlu1 %v1744_v31, %s1546_s23 }
 0x2ac   : > { %v708_v33 = vpop.permute.xlu1 %707  ;;  %v822_v37 = vpop.permute.xlu0 %821 }
 0x2ad   : > { %v714_v34 = vsel %vm709_vm2, %v708_v33, 0 }
 0x2ae   : > { %1364 = vmatpush3.bf16.xpose.msra.mxu1 %v714_v34 }
 0x2af   : > { %1375 = vmatprep.subr.bf16.mxu1 %v1542_v10 }
 0x2b0   : > { %v824_v35 = vpop.permute.xlu1 %823 }
 0x2b1   : > { %v829_v36 = vsel %vm709_vm2, %v824_v35, 0 }
 0x2b5   : > { %1366 = vmatmul.mubr.msk.bf16.vlgmr.msra.gmra.mrb[0].mxu1 %vm709_vm2, %v1744_v31 }
 0x2b6   : > { %1376 = vmatpush3.bf16.xpose.msra.mxu1 %v829_v36  ;;  %1377 = vmatprep.mubr.msk.bf16.mxu1 %vm1543_vm1, %v1542_v10 }
 0x2b7   : > { %1387 = vmatprep.subr.bf16.mxu1 %v1542_v10 }
 0x2bd   : > { %1378 = vmatmul.mubr.msk.bf16.vlgmr.msra.gmra.mrb[4].mxu1 %vm709_vm2, %v822_v37  ;;  %v1319_v37 = vld [vmem:[%s1931_s8] ss:$0 sm:$0xff] }
 0x2be   : > { %1391 = vmatprep.mubr.msk.bf16.mxu1 %vm1543_vm1, %v1542_v10  ;;  %1388 = vmatpush3.bf16.msra.mxu1 %v945_v22 }
 0x2bf   : > { %1389 = vmatprep.subr.bf16.mxu1 %v1542_v10 }
 0x2c2   : > { %1390 = vmatpush3.bf16.msra.mxu1 %v946_v25 }
 0x2c3   : > { %1403 = vmatprep.subr.bf16.mxu1 %v1542_v10 }
 0x388   : > { %v750_v46 = vpop.f32.mrb[0].mxu1 }
 0x389   : > { %v756_v47 = vmul.f32 0.25, %v750_v46  ;;  %v1367_v48 = vpop.f32.mrb[1].mxu1 }
 0x38a   : > { %v753_v49 = vpop.f32.mrb[2].mxu1 }
 0x38b   : > { %v1368_v50 = vpop.f32.mrb[3].mxu1  ;;  %v757_v51 = vadd.f32 %v756_v47, %v704_v45 }
 0x38c   : > { %v1028_v50 = vld [vmem:[%s1934_s11] sm:$0xff] }
 0x38d   : > { %v759_v52 = vsel %vm758_vm4, %v757_v51, -inf }
 0x38e   : > { %760 = vmax.xlane.f32.xlu1 %v759_v52  ;;  %v1030_v52 = vld [vmem:[%s1934_s11 + $0x10] sm:$0xff] }
 0x390   : > { %v865_v53 = vpop.f32.mrb[4].mxu1 }
 0x391   : > { %v871_v54 = vmul.f32 0.25, %v865_v53  ;;  %v1379_v55 = vpop.f32.mrb[5].mxu1  ;;  %v1031_v53 = vld [vmem:[%s1934_s11 + $0x18] sm:$0xff] }
 0x392   : > { %v868_v56 = vpop.f32.mrb[6].mxu1 }
 0x393   : > { %v1380_v57 = vpop.f32.mrb[7].mxu1  ;;  %v872_v58 = vadd.f32 %v871_v54, %v704_v45  ;;  %v1033_v54 = vpack.c.bf16 %v1031_v53, %v1030_v52 }
 0x395   : > { %v873_v59 = vsel %vm758_vm4, %v872_v58, -inf }
 0x396   : > { %874 = vmax.xlane.f32.xlu0 %v873_v59  ;;  %v1321_v59 = vld [vmem:[%s1932_s9] ss:$0 sm:$0xff] }
 0x3ac   : > { %885 = vrot.lane.b32.xlu0 %v1744_v31, %s1547_s29  ;;  %s1822_s29 = sshll.u32 %s1947_s19, 3 }
 0x3ad   : > { %s1948_s23 = scalar_lea.vmem [#allocation3], %s1822_s29  ;;  %s1969_s21 = scalar_lea.vmem [#allocation3], %s1822_s29 }
 0x41b   : > { %v761_v60 = vpop.xlane.xlu1 %760 }
 0x41c   : > { %v762_v61 = vsub.f32 %v757_v51, %v761_v60  ;;  %v1029_v51 = vld [vmem:[%s1934_s11 + $0x8] sm:$0xff] }
 0x41e   : > { %v763_v62 = vmul.f32 1.442695, %v762_v61  ;;  %v1322_v61 = vld [vmem:[%s1933_s10] ss:$0 sm:$0xff] }
 0x420   : > { %1464 = vpow2.f32 %v763_v62 }
 0x423   : > { %v875_v63 = vpop.xlane.xlu0 %874 }
 0x424   : > { %v876_v0 = vsub.f32 %v872_v58, %v875_v63 }
 0x426   : > { %v877_v1 = vmul.f32 1.442695, %v876_v0 }
 0x427   : > { %v886_v13 = vpop.permute.xlu0 %885 }
 0x428   : > { %1466 = vpow2.f32 %v877_v1  ;;  %v891_v15 = vsel %vm776_vm5, %v886_v13, 0  ;;  %v1094_v1 = vld [vmem:[%s1936_s13] sm:$0xff] }
 0x42a   : > { %v1465_v2 = vpop.eup %1464 }
 0x42b   : > { %v765_v3 = vsel %vm758_vm4, %v1465_v2, 0.0 }
 0x42c   : > { %766 = vadd.xlane.f32.xlu1 %v765_v3 }
 0x432   : > { %v1467_v4 = vpop.eup %1466 }
 0x433   : > { %v879_v5 = vsel %vm758_vm4, %v1467_v4, 0.0 }
 0x434   : > { %880 = vadd.xlane.f32.xlu1 %v879_v5  ;;  %v1097_v5 = vld [vmem:[%s1936_s13 + $0x18] sm:$0xff] }
 0x445   : > { %771 = vrot.lane.b32.xlu1 %v1744_v31, %s1548_s1  ;;  %s1210_s1 = sshll.u32 %s1969_s21, 4  ;;  %s1211_s1 = int_to_ptr.vmem [resolvable:$true] %s1210_s1 }
 0x446   : > { %s1478_s20 = scalar_lea.vmem %s1211_s1, 128  ;;  %p1485_p0 = scmp.lt.s32.totalorder %s1211_s1, %s1483_s5 }
 0x447   : > { %p1479_p11 = scmp.ne.s32.totalorder %s1211_s1, %s1478_s20  ;;  %p1486_p1 = scmp.lt.s32.totalorder %s1484_s6, %s1478_s20 }
 0x449   : > { %p1480_p12 = pnand %p1479_p11, %p1684_p5  ;;  %p1487_p2 = por %p1486_p1, %p1485_p0 }
 0x44b   : > { %p1481_p13 = pneg %p1480_p12 }
 0x44d   : > { %p1488_p3 = pnand %p1487_p2, %p1481_p13 }
 0x4b9   : > { %v767_v6 = vpop.xlane.xlu1 %766 }
 0x4ba   : > { %1468 = vrcp.f32 %v767_v6 }
 0x4c1   : > { %v881_v7 = vpop.xlane.xlu1 %880 }
 0x4c2   : > { %1470 = vrcp.f32 %v881_v7  ;;  %v1098_v7 = vld [vmem:[%s1936_s13 + $0x20] sm:$0xff] }
 0x4c4   : > { %v1469_v8 = vpop.eup %1468 }
 0x4c5   : > { %v769_v9 = vmul.f32 %v1469_v8, %v1465_v2  ;;  %v772_v11 = vpop.permute.xlu1 %771  ;;  %v1095_v2 = vld [vmem:[%s1936_s13 + $0x8] sm:$0xff] }
 0x4c6   : > { %v778_v12 = vsel %vm776_vm5, %v772_v11, 0  ;;  %v1102_v3 = vpack.c.bf16 %v1095_v2, %v1094_v1  ;;  %v1099_v8 = vld [vmem:[%s1936_s13 + $0x28] sm:$0xff]  ;;  %v1100_v11 = vld [vmem:[%s1936_s13 + $0x30] sm:$0xff] }
 0x4c7   : > { %1370 = vmatpush3.bf16.msra.mxu0 %v778_v12  ;;  %v770_v14 = vpack.c.bf16 %v769_v9, %v769_v9  ;;  %v1104_v9 = vpack.c.bf16 %v1099_v8, %v1098_v7  ;;  %v1101_v12 = vld [vmem:[%s1936_s13 + $0x38] sm:$0xff] }
 0x4c8   : > { %1381 = vmatprep.subr.bf16.mxu0 %v1542_v10  ;;  %v1105_v13 = vpack.c.bf16 %v1101_v12, %v1100_v11 }
 0x4ca   : > { %1372 = vmatmul.mubr.msk.bf16.vlgmr.msra.gmra.mrb[4].mxu0 %vm758_vm4, %v770_v14  ;;  %v1323_v14 = vld [vmem:[%s1935_s12] ss:$0 sm:$0xff] }
 0x4cb   : > { %1382 = vmatpush3.bf16.msra.mxu0 %v891_v15  ;;  %1383 = vmatprep.mubr.msk.bf16.mxu0 %vm1543_vm1, %v1542_v10 }
 0x4cc   : > { %v1471_v16 = vpop.eup %1470  ;;  %1395 = vmatprep.subr.bf16.mxu0 %v1542_v10 }
 0x4cd   : > { %v883_v17 = vmul.f32 %v1471_v16, %v1467_v4  ;;  %v1096_v4 = vld [vmem:[%s1936_s13 + $0x10] sm:$0xff] }
 0x4ce   : > { %v1103_v6 = vpack.c.bf16 %v1097_v5, %v1096_v4 }
 0x4cf   : > { %v884_v18 = vpack.c.bf16 %v883_v17, %v883_v17 }
 0x4d2   : > { %1384 = vmatmul.mubr.msk.bf16.vlgmr.msra.gmra.mrb[8].mxu0 %vm758_vm4, %v884_v18 }
 0x4d3   : > { %1399 = vmatprep.mubr.msk.bf16.mxu0 %vm1543_vm1, %v1542_v10 }
 0x59d   : > { %v814_v26 = vpop.f32.mrb[4].mxu0 }
 0x59e   : > { %820 = vst.msk [vmem:[#allocation2] sm:$0xff] %vm709_vm2, %v814_v26  ;;  %v1373_v27 = vpop.f32.mrb[5].mxu0 }
 0x59f   : > { %v817_v28 = vpop.f32.mrb[6].mxu0 }
 0x5a0   : > { %v1374_v29 = vpop.f32.mrb[7].mxu0 }
 0x5a5   : > { %v927_v30 = vpop.f32.mrb[8].mxu0 }
 0x5a6   : > { %934 = vrot.lane.b32.xlu1 %v927_v30, %s1549_s22  ;;  %v1385_v31 = vpop.f32.mrb[9].mxu0  ;;  %v1325_v30 = vld [vmem:[%s1937_s14] ss:$0 sm:$0xff]  ;;  %s1970_s22 = sand.u32 1, %s1532_s28  }
 0x5a7   : > { %v930_v32 = vpop.f32.mrb[10].mxu0  ;;  %s1194_s26 = scalar_lea.sflag [#allocation4], %s1970_s22 }
 0x5a8   : > { %v1386_v33 = vpop.f32.mrb[11].mxu0 }
 0x618   : > { %v935_v34 = vpop.permute.xlu1 %934 }
 0x619   : > { %938 = vst.msk [vmem:[#allocation2] sm:$0xff] %vm937_vm6, %v935_v34 }
 0x620   : > { %v939_v35 = vld [vmem:[#allocation2] sm:$0xff] }
 0x621   : > { %v940_v36 = vpack.c.bf16 %v939_v35, %v939_v35 }
 0x623   : > { %1392 = vmatmul.mubr.msk.bf16.vlgmr.msra.gmra.mrb[8].mxu1 %vm598_vm0, %v940_v36 }
 0x624   : > { %1411 = vmatprep.mubr.msk.bf16.mxu1 %vm1543_vm1, %v1542_v10  ;;  %1404 = vmatpush3.bf16.msra.mxu1 %v1102_v3 }
 0x625   : > { %1405 = vmatprep.subr.bf16.mxu1 %v1542_v10 }
 0x628   : > { %1406 = vmatpush3.bf16.msra.mxu1 %v1103_v6 }
 0x629   : > { %1407 = vmatprep.subr.bf16.mxu1 %v1542_v10 }
 0x62c   : > { %1408 = vmatpush3.bf16.msra.mxu1 %v1104_v9 }
 0x62d   : > { %1409 = vmatprep.subr.bf16.mxu1 %v1542_v10 }
 0x630   : > { %1410 = vmatpush3.bf16.msra.mxu1 %v1105_v13 }
 0x6f6   : > { %v991_v38 = vpop.f32.mrb[8].mxu1 }
 0x6f7   : > { %v992_v39 = vadd.f32 %v1319_v37, %v991_v38  ;;  %v1393_v40 = vpop.f32.mrb[9].mxu1 }
 0x6f8   : > { %v994_v41 = vpop.f32.mrb[10].mxu1 }
 0x6f9   : > { %v1394_v42 = vpop.f32.mrb[11].mxu1  ;;  %v997_v43 = vadd.f32 %v992_v39, %v1735_v23  ;;  %v1032_v23 = vpack.c.bf16 %v1029_v51, %v1028_v50 }
 0x6fb   : > { %v998_v44 = vsel %vm598_vm0, %v997_v43, 0.0  ;;  %1396 = vmatpush3.bf16.msra.mxu0 %v1032_v23 }
 0x6fc   : > { %999 = vadd.xlane.f32.xlu1 %v998_v44  ;;  %1397 = vmatprep.subr.bf16.mxu0 %v1542_v10 }
 0x6ff   : > { %1398 = vmatpush3.bf16.msra.mxu0 %v1033_v54 }
 0x789   : > { %v1000_v45 = vpop.xlane.xlu1 %999 }
 0x78a   : > { %v1001_v46 = vmul.f32 0.03125, %v1000_v45 }
 0x78c   : > { %v1002_v47 = vsub.f32 %v997_v43, %v1001_v46 }
 0x78e   : > { %v1003_v48 = vmul.f32 %v1002_v47, %v1002_v47 }
 0x790   : > { %v1004_v49 = vsel %vm598_vm0, %v1003_v48, 0.0 }
 0x791   : > { %1005 = vadd.xlane.f32.xlu0 %v1004_v49 }
 0x81e   : > { %v1006_v55 = vpop.xlane.xlu0 %1005 }
 0x81f   : > { %v1007_v56 = vmul.f32 0.03125, %v1006_v55 }
 0x821   : > { %v1008_v57 = vadd.f32 1e-12, %v1007_v56 }
 0x823   : > { %1472 = vrsqrt.f32 %v1008_v57 }
 0x82d   : > { %v1473_v58 = vpop.eup %1472 }
 0x82e   : > { %v1010_v60 = vmul.f32 %v1473_v58, %v1002_v47 }
 0x830   : > { %v1018_v62 = vmul.f32 %v1321_v59, %v1010_v60 }
 0x832   : > { %v1026_v63 = vadd.f32 %v1322_v61, %v1018_v62 }
 0x834   : > { %v1027_v0 = vpack.c.bf16 %v1026_v63, %v1026_v63  ;;  %1187 = vst.msk [vmem:[%s1948_s23] sm:$0xff] %vm598_vm0, %v1026_v63  ;;  %s1873_s23 = scalar_lea.hbm %s1941_s18, %s1330_s25 }
 0x836   : > { %1400 = vmatmul.mubr.msk.bf16.vlgmr.msra.gmra.mrb[12].mxu0 %vm598_vm0, %v1027_v0 }
 0x909   : > { %v1078_v15 = vpop.f32.mrb[12].mxu0 }
 0x90a   : > { %v1079_v16 = vadd.f32 %v1323_v14, %v1078_v15  ;;  %v1401_v17 = vpop.f32.mrb[13].mxu0 }
 0x90b   : > { %v1081_v18 = vpop.f32.mrb[14].mxu0 }
 0x90c   : > { %v1085_v19 = vmul.f32 0.044715, %v1079_v16  ;;  %v1402_v20 = vpop.f32.mrb[15].mxu0  ;;  %v1084_v27 = vmul.f32 0.5, %v1079_v16 }
 0x90e   : > { %v1086_v21 = vmul.f32 %v1085_v19, %v1079_v16 }
 0x910   : > { %v1087_v22 = vmul.f32 %v1086_v21, %v1079_v16 }
 0x912   : > { %v1088_v24 = vadd.f32 %v1087_v22, %v1079_v16 }
 0x914   : > { %v1089_v25 = vmul.f32 0.7978846, %v1088_v24 }
 0x916   : > { %1474 = vtanh.f32 %v1089_v25 }
 0x920   : > { %v1475_v26 = vpop.eup %1474 }
 0x921   : > { %v1091_v28 = vadd.f32 1.0, %v1475_v26 }
 0x923   : > { %v1092_v10 = vmul.f32 %v1091_v28, %v1084_v27 }
 0x925   : > { %v1093_v29 = vpack.c.bf16 %v1092_v10, %v1092_v10 }
 0x927   : > { %1412 = vmatmul.mubr.msk.bf16.vlgmr.msra.gmra.mrb[12].mxu1 %vm1113_vm7, %v1093_v29 }
 0x9fa   : > { %v1151_v31 = vpop.f32.mrb[12].mxu1 }
 0x9fb   : > { %v1152_v32 = vadd.f32 %v1325_v30, %v1151_v31  ;;  %v1413_v33 = vpop.f32.mrb[13].mxu1 }
 0x9fc   : > { %v1154_v34 = vpop.f32.mrb[14].mxu1 }
 0x9fd   : > { %v1414_v35 = vpop.f32.mrb[15].mxu1  ;;  %v1157_v36 = vadd.f32 %v1152_v32, %v1026_v63 }
 0x9ff   : > { %v1158_v37 = vsel %vm598_vm0, %v1157_v36, 0.0 }
 0xa00   : > { %1159 = vadd.xlane.f32.xlu1 %v1158_v37 }
 0xa8d   : > { %v1160_v38 = vpop.xlane.xlu1 %1159 }
 0xa8e   : > { %v1161_v39 = vmul.f32 0.03125, %v1160_v38 }
 0xa90   : > { %v1162_v40 = vsub.f32 %v1157_v36, %v1161_v39 }
 0xa92   : > { %v1163_v41 = vmul.f32 %v1162_v40, %v1162_v40 }
 0xa94   : > { %v1164_v42 = vsel %vm598_vm0, %v1163_v41, 0.0 }
 0xa95   : > { %1165 = vadd.xlane.f32.xlu1 %v1164_v42 }
 0xa96   : > { %1491 = shalt.err (!%p1488_p3)
}
 0xa97   : > { %s1492_s0 = scalar_lea.hbm %s1873_s23, 128  ;;  %s1496_s4 = scalar_lea.hbm %s1941_s18, 256 }
 0xa98   : > { %p1493_p4 = scmp.ne.s32.totalorder %s1873_s23, %s1492_s0  ;;  %p1497_p9 = scmp.lt.u32.totalorder %s1873_s23, %s1941_s18 }
 0xa99   : > { %p1498_p10 = scmp.lt.u32.totalorder %s1496_s4, %s1492_s0  ;;  %p1500_p12 = scmp.lt.u32.totalorder %s1492_s0, %s1873_s23 }
 0xa9a   : > { %p1494_p7 = pnand %p1493_p4, %p1684_p5 }
 0xa9b   : > { %p1499_p11 = por %p1498_p10, %p1497_p9 }
 0xa9c   : > { %p1495_p8 = pneg %p1494_p7 }
 0xa9d   : > { %p1501_p13 = por %p1500_p12, %p1499_p11 }
 0xa9f   : > { %p1502_p0 = pnand %p1501_p13, %p1495_p8 }
 0xaa1   : > { %1505 = shalt.err (!%p1502_p0)
}
 0xaa2   : > { %1415 = dma.vmem_to_hbm [thread:$0]  (%p1684_p5), %s1211_s1, 128, %s1873_s23, %s1194_s26   ;;  %v1327_v47 = vld [vmem:[%s1938_s15] ss:$0 sm:$0xff] }
 0xaa3   : > { %v1328_v49 = vld [vmem:[%s1939_s16] ss:$0 sm:$0xff]  ;;  %s1971_s20 = sshll.u32 %s1696_s24, 3 }
 0xaa4   : > { %s595_s1 = scalar_lea.vmem %s1940_s17, %s1971_s20 }
 0xb22   : > { %v1166_v43 = vpop.xlane.xlu1 %1165 }
 0xb23   : > { %v1167_v44 = vmul.f32 0.03125, %v1166_v43 }
 0xb25   : > { %v1168_v45 = vadd.f32 1e-12, %v1167_v44 }
 0xb27   : > { %1476 = vrsqrt.f32 %v1168_v45 }
 0xb31   : > { %v1477_v46 = vpop.eup %1476 }
 0xb32   : > { %v1170_v48 = vmul.f32 %v1477_v46, %v1162_v40 }
 0xb34   : > { %v1178_v50 = vmul.f32 %v1327_v47, %v1170_v48 }
 0xb36   : > { %v1186_v51 = vadd.f32 %v1328_v49, %v1178_v50 }
 0xb38   : > { %1188 = vst.msk [vmem:[%s595_s1] sm:$0xff] %vm598_vm0, %v1186_v51 }
 0xb39 PF: > { %p1421_p5 = scmp.ge.s32.totalorder %s1540_s30, 2  ;;  %s1229_s26 = sand.u32 1, %s1528_s27  }
 0xb3a   : > { %s1230_s29 = scalar_lea.sflag [#allocation4], %s1229_s26 }
 0xb3b   : > { %p1418_p1 = pnand %p1421_p5, %p1688_p6 }
 0xb3d   : > { %1523 = dma.done.wait (!%p1418_p1), %s1230_s29, 128  }
 0xb3e   : > { %1525 = vsyncadd (!%p1418_p1), %s1230_s29, 4294967168  ;;  %s1973_s30 = sld [smem:[#allocation7_spill]]  ;;  %s1974_s24 = sld [smem:[#allocation6_spill]] }
 0xb3f   : > { %s1975_s29 = sld [smem:[#allocation8_spill]]  ;;  %s1976_s27 = smov %s1532_s28 }
 0xb44   : > { %p29_p2 = scmp.ge.s32.totalorder %s1973_s30, 4   ;;  %s1977_s28 = smov %s1974_s24 }
 0xb46   :  { %31 = sbr.rel (!%p29_p2) target bundleno = 11 (0xb), region = 138 }
 0xb4d   :  { %1235 = vsyncpa [#allocation4], 1 }
 0xb4e   :  { %1237 = vsyncpa [#allocation4 + $0x1], 1 }

</bundles_post_ra>
